<compile_context>
chip_gen: v7x
topology: tpu7x:2x2x1
jax: 0.10.0
libtpu: 0.0.40
codegen_flags: <defaults>
</compile_context>

<pallas_src>
import functools
import math

import numpy as np
import jax
import jax.numpy as jnp
from jax import lax
from jax.experimental import pallas as pl
from jax.experimental.pallas import tpu as pltpu


# ---------------------------------------------------------------------------
# Bilinear resize operators (exact PyTorch align_corners=False, no antialias)
# ---------------------------------------------------------------------------
def _bilinear_matrix_np(in_size: int, out_size: int) -> np.ndarray:
    """(out_size, in_size) 1-D bilinear interpolation matrix, PyTorch semantics."""
    scale = in_size / out_size
    i = np.arange(out_size, dtype=np.float64)
    src = (i + 0.5) * scale - 0.5
    src = np.maximum(src, 0.0)                       # PyTorch clamps negative coords
    i0 = np.minimum(np.floor(src).astype(np.int64), in_size - 1)
    i1 = np.minimum(i0 + 1, in_size - 1)
    w1 = src - i0
    w0 = 1.0 - w1
    m = np.zeros((out_size, in_size), dtype=np.float64)
    m[np.arange(out_size), i0] += w0
    m[np.arange(out_size), i1] += w1
    return m


def _resize_operator_t(in_h, in_w, out_h, out_w) -> jnp.ndarray:
    """(in_h*in_w, out_h*out_w) operator R^T such that flat_out = flat_in @ R^T."""
    r = np.kron(_bilinear_matrix_np(in_h, out_h), _bilinear_matrix_np(in_w, out_w))
    return jnp.asarray(r.T.astype(np.float32))


def bilinear_resize_nchw(x, out_h, out_w):
    """Pure-JAX reference resize (separable), PyTorch bilinear semantics."""
    _, _, h, w = x.shape
    mh = jnp.asarray(_bilinear_matrix_np(h, out_h).astype(np.float32))
    mw = jnp.asarray(_bilinear_matrix_np(w, out_w).astype(np.float32))
    return jnp.einsum("oh,bchw,pw->bcop", mh, x, mw)


def _tap_masks(H: int, W: int) -> jnp.ndarray:
    """(9, H*W) f32 validity masks for the 9 conv taps (implements zero padding)."""
    p = np.arange(H * W)
    h, w = p // W, p % W
    masks = []
    for oy in (-1, 0, 1):
        for ox in (-1, 0, 1):
            valid = ((h + oy >= 0) & (h + oy < H) &
                     (w + ox >= 0) & (w + ox < W))
            masks.append(valid.astype(np.float32))
    return jnp.asarray(np.stack(masks, axis=0))


# ---------------------------------------------------------------------------
# In-kernel math
# ---------------------------------------------------------------------------
def _gelu_exact(x):
    return 0.5 * x * (1.0 + lax.erf(x * (1.0 / math.sqrt(2.0))))


def _instance_norm_rows(y, eps):
    # y: (C, H*W); per-channel normalization over the spatial (lane) axis.
    # Two-pass (mean subtracted before the variance reduction) to avoid the
    # E[x^2]-E[x]^2 cancellation; biased variance matches PyTorch.
    mean = jnp.mean(y, axis=-1, keepdims=True)
    c = y - mean
    var = jnp.mean(c * c, axis=-1, keepdims=True)
    return c * lax.rsqrt(var + eps)


def _conv3x3_taps(x_groups, w_flat_ref, masks, H, W):
    """3x3 'same' conv (zero pad, no bias) in the lane-dense layout.

    x_groups:   list of (c_g, N) arrays whose channel-concat is the conv input
                (N = H*W, row-major).  Groups stay separate, so neither the
                concatenated input nor an im2col patch matrix is materialized.
    w_flat_ref: Ref (Cout, 9*Cin), tap-major blocks of Cin (= sum of c_g).
    masks:      (9, N) f32 border-validity masks (== the zero padding).

    Per tap t: r_t = sum_g W_t_g @ x_g on the UNSHIFTED inputs, then roll+mask
    the (Cout, N) output (cheaper than shifting the (Cin, N) input when
    Cout <= Cin) and accumulate.  The center tap needs no roll and no mask.
    """
    cin = sum(int(g.shape[0]) for g in x_groups)
    n = int(x_groups[0].shape[1])
    w_flat = w_flat_ref[...]                              # (Cout, 9*Cin), hoisted
    acc = None
    t = 0
    for oy in (-1, 0, 1):
        for ox in (-1, 0, 1):
            k = oy * W + ox
            r = None
            off = t * cin
            for g in x_groups:
                cg = int(g.shape[0])
                part = jnp.dot(w_flat[:, off:off + cg], g,
                               preferred_element_type=jnp.float32)
                r = part if r is None else r + part
                off += cg
            if k != 0:
                # result[p] = r[p + k]; wrap-around lanes land where mask == 0.
                r = pltpu.roll(r, shift=(-k) % n, axis=1) * masks[t:t + 1, :]
            acc = r if acc is None else acc + r
            t += 1
    return acc


def _fused_kernel(masks_ref, x4_ref, x8_ref, x16_ref, x32_ref,
                  r4_ref, r16_ref, r32_ref, w1_ref, w2_ref, out_ref,
                  *, H, W, eps):
    f32 = jnp.float32
    mm_dtype = w1_ref.dtype
    masks = masks_ref[...]                                # (9, HW), loaded once

    # Fused bilinear resizes: one lane-dense matmul per scale, all in VMEM.
    x4r = jnp.dot(x4_ref[...], r4_ref[...], preferred_element_type=f32)
    x16r = jnp.dot(x16_ref[...], r16_ref[...], preferred_element_type=f32)
    x32r = jnp.dot(x32_ref[...], r32_ref[...], preferred_element_type=f32)
    groups = [x4r.astype(mm_dtype), x8_ref[...].astype(mm_dtype),
              x16r.astype(mm_dtype), x32r.astype(mm_dtype)]

    # conv1 -> InstanceNorm -> GELU (accumulated over the 4 channel groups).
    y = _conv3x3_taps(groups, w1_ref, masks, H, W)        # (Cout, HW) f32
    y = _gelu_exact(_instance_norm_rows(y, eps))

    # conv2 -> InstanceNorm -> GELU.
    z = _conv3x3_taps([y.astype(mm_dtype)], w2_ref, masks, H, W)
    z = _gelu_exact(_instance_norm_rows(z, eps))

    out_ref[...] = z.astype(out_ref.dtype)


# ---------------------------------------------------------------------------
# Wrapper: whole forward pass in a single pallas_call
# ---------------------------------------------------------------------------
def dino_multi2single_scale(x_4, x_8, x_16, x_32, w1_oihw, w2_oihw, *,
                            eps=1e-5, compute_dtype=jnp.float32):
    """All x_* are NCHW float32. Returns NCHW (B, out_channels, H8, W8).

    compute_dtype=jnp.bfloat16 casts matmul OPERANDS only (f32 accumulation,
    f32 norm/GELU) - the recommended setting for v6e/v7x MXUs.
    """
    B, c4, h4, w4 = x_4.shape
    _, c8, H, W = x_8.shape
    _, c16, h16, w16 = x_16.shape
    _, c32, h32, w32 = x_32.shape
    cin = c4 + c8 + c16 + c32
    cout = w1_oihw.shape[0]
    hw = H * W
    # TODO(synk): if H*W is not a multiple of 128 at real DINO sizes, pad the
    # flattened spatial axis (and extend the tap masks) so stores stay unmasked.

    # Lane-dense flattening; no transposes anywhere.
    x4_flat = x_4.reshape(B, c4, h4 * w4).astype(compute_dtype)
    x8_flat = x_8.reshape(B, c8, hw).astype(compute_dtype)
    x16_flat = x_16.reshape(B, c16, h16 * w16).astype(compute_dtype)
    x32_flat = x_32.reshape(B, c32, h32 * w32).astype(compute_dtype)

    # Per-scale bilinear operators (kron of 1-D matrices), constant across grid.
    r4t = _resize_operator_t(h4, w4, H, W).astype(compute_dtype)
    r16t = _resize_operator_t(h16, w16, H, W).astype(compute_dtype)
    r32t = _resize_operator_t(h32, w32, H, W).astype(compute_dtype)

    # Conv weights pre-flattened to the matmul layout (tap-major blocks of Cin).
    w1_flat = jnp.transpose(w1_oihw, (0, 2, 3, 1)).reshape(cout, 9 * cin)
    w2_flat = jnp.transpose(w2_oihw, (0, 2, 3, 1)).reshape(cout, 9 * cout)
    w1_flat = w1_flat.astype(compute_dtype)
    w2_flat = w2_flat.astype(compute_dtype)

    masks = _tap_masks(H, W)                              # (9, HW) f32

    # Right-sized VMEM budget + advisory cost estimate.
    itemsize = jnp.dtype(compute_dtype).itemsize
    const_bytes = (masks.size * 4
                   + (r4t.size + r16t.size + r32t.size
                      + w1_flat.size + w2_flat.size) * itemsize)
    per_step_bytes = (((x4_flat.size + x8_flat.size + x16_flat.size
                        + x32_flat.size) // B) * itemsize + cout * hw * 4)
    vmem_limit = int(min(100 * 1024 * 1024,
                         2 * (const_bytes + 2 * per_step_bytes) + (4 << 20)))
    flops = 2 * B * hw * (c4 * h4 * w4 + c16 * h16 * w16 + c32 * h32 * w32
                          + 9 * cout * (cin + cout))
    cost = pl.CostEstimate(flops=int(flops),
                           transcendentals=int(2 * B * cout * hw),
                           bytes_accessed=int(const_bytes + B * per_step_bytes))

    kernel = functools.partial(_fused_kernel, H=H, W=W, eps=eps)
    out = pl.pallas_call(
        kernel,
        out_shape=jax.ShapeDtypeStruct((B, cout, hw), jnp.float32),
        grid_spec=pltpu.PrefetchScalarGridSpec(
            num_scalar_prefetch=0,
            grid=(B,),
            in_specs=[
                pl.BlockSpec((9, hw), lambda b: (0, 0)),                   # masks
                pl.BlockSpec((None, c4, h4 * w4), lambda b: (b, 0, 0)),    # x_4
                pl.BlockSpec((None, c8, hw), lambda b: (b, 0, 0)),         # x_8
                pl.BlockSpec((None, c16, h16 * w16), lambda b: (b, 0, 0)),  # x_16
                pl.BlockSpec((None, c32, h32 * w32), lambda b: (b, 0, 0)),  # x_32
                pl.BlockSpec((h4 * w4, hw), lambda b: (0, 0)),             # R_4^T
                pl.BlockSpec((h16 * w16, hw), lambda b: (0, 0)),           # R_16^T
                pl.BlockSpec((h32 * w32, hw), lambda b: (0, 0)),           # R_32^T
                pl.BlockSpec((cout, 9 * cin), lambda b: (0, 0)),           # w1
                pl.BlockSpec((cout, 9 * cout), lambda b: (0, 0)),          # w2
            ],
            out_specs=pl.BlockSpec((None, cout, hw), lambda b: (b, 0, 0)),
        ),
        compiler_params=pltpu.CompilerParams(
            dimension_semantics=("parallel",),
            vmem_limit_bytes=vmem_limit),
        cost_estimate=cost,
    )(masks, x4_flat, x8_flat, x16_flat, x32_flat, r4t, r16t, r32t,
      w1_flat, w2_flat)

    return out.reshape(B, cout, H, W)                     # already NCHW


# ---------------------------------------------------------------------------
# Pure-JAX reference (lax.conv) for verification
# ---------------------------------------------------------------------------
def _ref_compress_nchw(x, w1_oihw, w2_oihw, eps=1e-5):
    def block(x, w):
        y = lax.conv_general_dilated(
            x, w, window_strides=(1, 1), padding="SAME",
            dimension_numbers=("NCHW", "OIHW", "NCHW"))
        mean = jnp.mean(y, axis=(2, 3), keepdims=True)
        var = jnp.mean((y - mean) ** 2, axis=(2, 3), keepdims=True)
        y = (y - mean) * lax.rsqrt(var + eps)
        return _gelu_exact(y)
    return block(block(x, w1_oihw), w2_oihw)


if __name__ == "__main__":
    key = jax.random.PRNGKey(0)
    k4, k8, k16, k32, kw1, kw2 = jax.random.split(key, 6)

    B, Cs = 2, 4                      # 4 feature channels per scale
    H8 = W8 = 16
    in_channels = 4 * Cs              # 16 after concat
    out_channels = 8

    x_4 = jax.random.normal(k4, (B, Cs, 2 * H8, 2 * W8), jnp.float32)
    x_8 = jax.random.normal(k8, (B, Cs, H8, W8), jnp.float32)
    x_16 = jax.random.normal(k16, (B, Cs, H8 // 2, W8 // 2), jnp.float32)
    x_32 = jax.random.normal(k32, (B, Cs, H8 // 4, W8 // 4), jnp.float32)

    # Deterministic conv weights (PyTorch OIHW layout), no bias.
    w1 = jax.random.normal(kw1, (out_channels, in_channels, 3, 3), jnp.float32)
    w1 = w1 / math.sqrt(in_channels * 9)
    w2 = jax.random.normal(kw2, (out_channels, out_channels, 3, 3), jnp.float32)
    w2 = w2 / math.sqrt(out_channels * 9)

    out = jax.jit(dino_multi2single_scale)(x_4, x_8, x_16, x_32, w1, w2)
    out = jax.block_until_ready(out)

    # Verify the fully fused kernel (resizes + concat + compress) end to end.
    x_4_8 = bilinear_resize_nchw(x_4, H8, W8)
    x_16_8 = bilinear_resize_nchw(x_16, H8, W8)
    x_32_8 = bilinear_resize_nchw(x_32, H8, W8)
    x_cat = jnp.concatenate([x_4_8, x_8, x_16_8, x_32_8], axis=1)
    ref = _ref_compress_nchw(x_cat, w1, w2)

    assert out.shape == (B, out_channels, H8, W8), out.shape
    np.testing.assert_allclose(np.asarray(out), np.asarray(ref),
                               rtol=1e-3, atol=1e-3)
    print("KERNEL_OK")
</pallas_src>

<mosaic_0001>
module attributes {stable_mosaic.version = 11 : i64} {
  func.func @_fused_kernel(%arg0: i32, %arg1: memref<9x256xf32, #tpu.memory_space<vmem>>, %arg2: memref<1x4x1024xf32, #tpu.memory_space<vmem>>, %arg3: memref<1x4x256xf32, #tpu.memory_space<vmem>>, %arg4: memref<1x4x64xf32, #tpu.memory_space<vmem>>, %arg5: memref<1x4x16xf32, #tpu.memory_space<vmem>>, %arg6: memref<1024x256xf32, #tpu.memory_space<vmem>>, %arg7: memref<64x256xf32, #tpu.memory_space<vmem>>, %arg8: memref<16x256xf32, #tpu.memory_space<vmem>>, %arg9: memref<8x144xf32, #tpu.memory_space<vmem>>, %arg10: memref<8x72xf32, #tpu.memory_space<vmem>>, %arg11: memref<1x8x256xf32, #tpu.memory_space<vmem>>) attributes {dimension_semantics = [#tpu.dimension_semantics<parallel>], iteration_bounds = array<i64: 2>, scalar_prefetch = 0 : i64, scratch_operands = 0 : i64, tpu.core_type = #tpu.core_type<tc>, window_params = [{pipeline_mode = #tpu.pipeline_mode<synchronous>, transform_indices = @transform_0, window_bounds = array<i64: 9, 256>}, {transform_indices = @transform_1, window_bounds = array<i64: 1, 4, 1024>}, {transform_indices = @transform_2, window_bounds = array<i64: 1, 4, 256>}, {transform_indices = @transform_3, window_bounds = array<i64: 1, 4, 64>}, {transform_indices = @transform_4, window_bounds = array<i64: 1, 4, 16>}, {pipeline_mode = #tpu.pipeline_mode<synchronous>, transform_indices = @transform_5, window_bounds = array<i64: 1024, 256>}, {pipeline_mode = #tpu.pipeline_mode<synchronous>, transform_indices = @transform_6, window_bounds = array<i64: 64, 256>}, {pipeline_mode = #tpu.pipeline_mode<synchronous>, transform_indices = @transform_7, window_bounds = array<i64: 16, 256>}, {pipeline_mode = #tpu.pipeline_mode<synchronous>, transform_indices = @transform_8, window_bounds = array<i64: 8, 144>}, {pipeline_mode = #tpu.pipeline_mode<synchronous>, transform_indices = @transform_9, window_bounds = array<i64: 8, 72>}, {transform_indices = @transform_10, window_bounds = array<i64: 1, 8, 256>}]} {
    %c0 = arith.constant 0 : index
    %c0_0 = arith.constant 0 : index
    %0 = vector.load %arg1[%c0, %c0_0] : memref<9x256xf32, #tpu.memory_space<vmem>>, vector<9x256xf32>
    %c0_1 = arith.constant 0 : index
    %c0_2 = arith.constant 0 : index
    %c0_3 = arith.constant 0 : index
    %1 = vector.load %arg2[%c0_1, %c0_2, %c0_3] : memref<1x4x1024xf32, #tpu.memory_space<vmem>>, vector<1x4x1024xf32>
    %2 = vector.shape_cast %1 : vector<1x4x1024xf32> to vector<4x1024xf32>
    %c0_4 = arith.constant 0 : index
    %c0_5 = arith.constant 0 : index
    %3 = vector.load %arg6[%c0_4, %c0_5] : memref<1024x256xf32, #tpu.memory_space<vmem>>, vector<1024x256xf32>
    %cst = arith.constant dense<0.000000e+00> : vector<4x256xf32>
    %4 = tpu.matmul %2, %3, %cst {dimension_numbers = #tpu.dot_dimension_numbers<[1], [0], [0], [1], [0, 0, 1, 1], [], []>} : vector<4x1024xf32>, vector<1024x256xf32>, vector<4x256xf32> -> vector<4x256xf32>
    %c0_6 = arith.constant 0 : index
    %c0_7 = arith.constant 0 : index
    %c0_8 = arith.constant 0 : index
    %5 = vector.load %arg4[%c0_6, %c0_7, %c0_8] : memref<1x4x64xf32, #tpu.memory_space<vmem>>, vector<1x4x64xf32>
    %6 = vector.shape_cast %5 : vector<1x4x64xf32> to vector<4x64xf32>
    %c0_9 = arith.constant 0 : index
    %c0_10 = arith.constant 0 : index
    %7 = vector.load %arg7[%c0_9, %c0_10] : memref<64x256xf32, #tpu.memory_space<vmem>>, vector<64x256xf32>
    %cst_11 = arith.constant dense<0.000000e+00> : vector<4x256xf32>
    %8 = tpu.matmul %6, %7, %cst_11 {dimension_numbers = #tpu.dot_dimension_numbers<[1], [0], [0], [1], [0, 0, 1, 1], [], []>} : vector<4x64xf32>, vector<64x256xf32>, vector<4x256xf32> -> vector<4x256xf32>
    %c0_12 = arith.constant 0 : index
    %c0_13 = arith.constant 0 : index
    %c0_14 = arith.constant 0 : index
    %9 = vector.load %arg5[%c0_12, %c0_13, %c0_14] : memref<1x4x16xf32, #tpu.memory_space<vmem>>, vector<1x4x16xf32>
    %10 = vector.shape_cast %9 : vector<1x4x16xf32> to vector<4x16xf32>
    %c0_15 = arith.constant 0 : index
    %c0_16 = arith.constant 0 : index
    %11 = vector.load %arg8[%c0_15, %c0_16] : memref<16x256xf32, #tpu.memory_space<vmem>>, vector<16x256xf32>
    %cst_17 = arith.constant dense<0.000000e+00> : vector<4x256xf32>
    %12 = tpu.matmul %10, %11, %cst_17 {dimension_numbers = #tpu.dot_dimension_numbers<[1], [0], [0], [1], [0, 0, 1, 1], [], []>} : vector<4x16xf32>, vector<16x256xf32>, vector<4x256xf32> -> vector<4x256xf32>
    %c0_18 = arith.constant 0 : index
    %c0_19 = arith.constant 0 : index
    %c0_20 = arith.constant 0 : index
    %13 = vector.load %arg3[%c0_18, %c0_19, %c0_20] : memref<1x4x256xf32, #tpu.memory_space<vmem>>, vector<1x4x256xf32>
    %14 = vector.shape_cast %13 : vector<1x4x256xf32> to vector<4x256xf32>
    %c0_21 = arith.constant 0 : index
    %c0_22 = arith.constant 0 : index
    %15 = vector.load %arg9[%c0_21, %c0_22] : memref<8x144xf32, #tpu.memory_space<vmem>>, vector<8x144xf32>
    %16 = vector.extract_strided_slice %15 {offsets = [0, 0], sizes = [8, 4], strides = [1, 1]} : vector<8x144xf32> to vector<8x4xf32>
    %cst_23 = arith.constant dense<0.000000e+00> : vector<8x256xf32>
    %17 = tpu.matmul %16, %4, %cst_23 {dimension_numbers = #tpu.dot_dimension_numbers<[1], [0], [0], [1], [0, 0, 1, 1], [], []>} : vector<8x4xf32>, vector<4x256xf32>, vector<8x256xf32> -> vector<8x256xf32>
    %18 = vector.extract_strided_slice %15 {offsets = [0, 4], sizes = [8, 4], strides = [1, 1]} : vector<8x144xf32> to vector<8x4xf32>
    %cst_24 = arith.constant dense<0.000000e+00> : vector<8x256xf32>
    %19 = tpu.matmul %18, %14, %cst_24 {dimension_numbers = #tpu.dot_dimension_numbers<[1], [0], [0], [1], [0, 0, 1, 1], [], []>} : vector<8x4xf32>, vector<4x256xf32>, vector<8x256xf32> -> vector<8x256xf32>
    %20 = arith.addf %17, %19 : vector<8x256xf32>
    %21 = vector.extract_strided_slice %15 {offsets = [0, 8], sizes = [8, 4], strides = [1, 1]} : vector<8x144xf32> to vector<8x4xf32>
    %cst_25 = arith.constant dense<0.000000e+00> : vector<8x256xf32>
    %22 = tpu.matmul %21, %8, %cst_25 {dimension_numbers = #tpu.dot_dimension_numbers<[1], [0], [0], [1], [0, 0, 1, 1], [], []>} : vector<8x4xf32>, vector<4x256xf32>, vector<8x256xf32> -> vector<8x256xf32>
    %23 = arith.addf %20, %22 : vector<8x256xf32>
    %24 = vector.extract_strided_slice %15 {offsets = [0, 12], sizes = [8, 4], strides = [1, 1]} : vector<8x144xf32> to vector<8x4xf32>
    %cst_26 = arith.constant dense<0.000000e+00> : vector<8x256xf32>
    %25 = tpu.matmul %24, %12, %cst_26 {dimension_numbers = #tpu.dot_dimension_numbers<[1], [0], [0], [1], [0, 0, 1, 1], [], []>} : vector<8x4xf32>, vector<4x256xf32>, vector<8x256xf32> -> vector<8x256xf32>
    %26 = arith.addf %23, %25 : vector<8x256xf32>
    %c17_i32 = arith.constant 17 : i32
    %27 = tpu.dynamic_rotate %26 by %c17_i32 dim 1 : vector<8x256xf32>, i32 -> vector<8x256xf32>
    %28 = vector.extract_strided_slice %0 {offsets = [0, 0], sizes = [1, 256], strides = [1, 1]} : vector<9x256xf32> to vector<1x256xf32>
    %29 = vector.broadcast %28 : vector<1x256xf32> to vector<8x256xf32>
    %30 = arith.mulf %27, %29 : vector<8x256xf32>
    %31 = vector.extract_strided_slice %15 {offsets = [0, 16], sizes = [8, 4], strides = [1, 1]} : vector<8x144xf32> to vector<8x4xf32>
    %cst_27 = arith.constant dense<0.000000e+00> : vector<8x256xf32>
    %32 = tpu.matmul %31, %4, %cst_27 {dimension_numbers = #tpu.dot_dimension_numbers<[1], [0], [0], [1], [0, 0, 1, 1], [], []>} : vector<8x4xf32>, vector<4x256xf32>, vector<8x256xf32> -> vector<8x256xf32>
    %33 = vector.extract_strided_slice %15 {offsets = [0, 20], sizes = [8, 4], strides = [1, 1]} : vector<8x144xf32> to vector<8x4xf32>
    %cst_28 = arith.constant dense<0.000000e+00> : vector<8x256xf32>
    %34 = tpu.matmul %33, %14, %cst_28 {dimension_numbers = #tpu.dot_dimension_numbers<[1], [0], [0], [1], [0, 0, 1, 1], [], []>} : vector<8x4xf32>, vector<4x256xf32>, vector<8x256xf32> -> vector<8x256xf32>
    %35 = arith.addf %32, %34 : vector<8x256xf32>
    %36 = vector.extract_strided_slice %15 {offsets = [0, 24], sizes = [8, 4], strides = [1, 1]} : vector<8x144xf32> to vector<8x4xf32>
    %cst_29 = arith.constant dense<0.000000e+00> : vector<8x256xf32>
    %37 = tpu.matmul %36, %8, %cst_29 {dimension_numbers = #tpu.dot_dimension_numbers<[1], [0], [0], [1], [0, 0, 1, 1], [], []>} : vector<8x4xf32>, vector<4x256xf32>, vector<8x256xf32> -> vector<8x256xf32>
    %38 = arith.addf %35, %37 : vector<8x256xf32>
    %39 = vector.extract_strided_slice %15 {offsets = [0, 28], sizes = [8, 4], strides = [1, 1]} : vector<8x144xf32> to vector<8x4xf32>
    %cst_30 = arith.constant dense<0.000000e+00> : vector<8x256xf32>
    %40 = tpu.matmul %39, %12, %cst_30 {dimension_numbers = #tpu.dot_dimension_numbers<[1], [0], [0], [1], [0, 0, 1, 1], [], []>} : vector<8x4xf32>, vector<4x256xf32>, vector<8x256xf32> -> vector<8x256xf32>
    %41 = arith.addf %38, %40 : vector<8x256xf32>
    %c16_i32 = arith.constant 16 : i32
    %42 = tpu.dynamic_rotate %41 by %c16_i32 dim 1 : vector<8x256xf32>, i32 -> vector<8x256xf32>
    %43 = vector.extract_strided_slice %0 {offsets = [1, 0], sizes = [1, 256], strides = [1, 1]} : vector<9x256xf32> to vector<1x256xf32>
    %44 = vector.broadcast %43 : vector<1x256xf32> to vector<8x256xf32>
    %45 = arith.mulf %42, %44 : vector<8x256xf32>
    %46 = arith.addf %30, %45 : vector<8x256xf32>
    %47 = vector.extract_strided_slice %15 {offsets = [0, 32], sizes = [8, 4], strides = [1, 1]} : vector<8x144xf32> to vector<8x4xf32>
    %cst_31 = arith.constant dense<0.000000e+00> : vector<8x256xf32>
    %48 = tpu.matmul %47, %4, %cst_31 {dimension_numbers = #tpu.dot_dimension_numbers<[1], [0], [0], [1], [0, 0, 1, 1], [], []>} : vector<8x4xf32>, vector<4x256xf32>, vector<8x256xf32> -> vector<8x256xf32>
    %49 = vector.extract_strided_slice %15 {offsets = [0, 36], sizes = [8, 4], strides = [1, 1]} : vector<8x144xf32> to vector<8x4xf32>
    %cst_32 = arith.constant dense<0.000000e+00> : vector<8x256xf32>
    %50 = tpu.matmul %49, %14, %cst_32 {dimension_numbers = #tpu.dot_dimension_numbers<[1], [0], [0], [1], [0, 0, 1, 1], [], []>} : vector<8x4xf32>, vector<4x256xf32>, vector<8x256xf32> -> vector<8x256xf32>
    %51 = arith.addf %48, %50 : vector<8x256xf32>
    %52 = vector.extract_strided_slice %15 {offsets = [0, 40], sizes = [8, 4], strides = [1, 1]} : vector<8x144xf32> to vector<8x4xf32>
    %cst_33 = arith.constant dense<0.000000e+00> : vector<8x256xf32>
    %53 = tpu.matmul %52, %8, %cst_33 {dimension_numbers = #tpu.dot_dimension_numbers<[1], [0], [0], [1], [0, 0, 1, 1], [], []>} : vector<8x4xf32>, vector<4x256xf32>, vector<8x256xf32> -> vector<8x256xf32>
    %54 = arith.addf %51, %53 : vector<8x256xf32>
    %55 = vector.extract_strided_slice %15 {offsets = [0, 44], sizes = [8, 4], strides = [1, 1]} : vector<8x144xf32> to vector<8x4xf32>
    %cst_34 = arith.constant dense<0.000000e+00> : vector<8x256xf32>
    %56 = tpu.matmul %55, %12, %cst_34 {dimension_numbers = #tpu.dot_dimension_numbers<[1], [0], [0], [1], [0, 0, 1, 1], [], []>} : vector<8x4xf32>, vector<4x256xf32>, vector<8x256xf32> -> vector<8x256xf32>
    %57 = arith.addf %54, %56 : vector<8x256xf32>
    %c15_i32 = arith.constant 15 : i32
    %58 = tpu.dynamic_rotate %57 by %c15_i32 dim 1 : vector<8x256xf32>, i32 -> vector<8x256xf32>
    %59 = vector.extract_strided_slice %0 {offsets = [2, 0], sizes = [1, 256], strides = [1, 1]} : vector<9x256xf32> to vector<1x256xf32>
    %60 = vector.broadcast %59 : vector<1x256xf32> to vector<8x256xf32>
    %61 = arith.mulf %58, %60 : vector<8x256xf32>
    %62 = arith.addf %46, %61 : vector<8x256xf32>
    %63 = vector.extract_strided_slice %15 {offsets = [0, 48], sizes = [8, 4], strides = [1, 1]} : vector<8x144xf32> to vector<8x4xf32>
    %cst_35 = arith.constant dense<0.000000e+00> : vector<8x256xf32>
    %64 = tpu.matmul %63, %4, %cst_35 {dimension_numbers = #tpu.dot_dimension_numbers<[1], [0], [0], [1], [0, 0, 1, 1], [], []>} : vector<8x4xf32>, vector<4x256xf32>, vector<8x256xf32> -> vector<8x256xf32>
    %65 = vector.extract_strided_slice %15 {offsets = [0, 52], sizes = [8, 4], strides = [1, 1]} : vector<8x144xf32> to vector<8x4xf32>
    %cst_36 = arith.constant dense<0.000000e+00> : vector<8x256xf32>
    %66 = tpu.matmul %65, %14, %cst_36 {dimension_numbers = #tpu.dot_dimension_numbers<[1], [0], [0], [1], [0, 0, 1, 1], [], []>} : vector<8x4xf32>, vector<4x256xf32>, vector<8x256xf32> -> vector<8x256xf32>
    %67 = arith.addf %64, %66 : vector<8x256xf32>
    %68 = vector.extract_strided_slice %15 {offsets = [0, 56], sizes = [8, 4], strides = [1, 1]} : vector<8x144xf32> to vector<8x4xf32>
    %cst_37 = arith.constant dense<0.000000e+00> : vector<8x256xf32>
    %69 = tpu.matmul %68, %8, %cst_37 {dimension_numbers = #tpu.dot_dimension_numbers<[1], [0], [0], [1], [0, 0, 1, 1], [], []>} : vector<8x4xf32>, vector<4x256xf32>, vector<8x256xf32> -> vector<8x256xf32>
    %70 = arith.addf %67, %69 : vector<8x256xf32>
    %71 = vector.extract_strided_slice %15 {offsets = [0, 60], sizes = [8, 4], strides = [1, 1]} : vector<8x144xf32> to vector<8x4xf32>
    %cst_38 = arith.constant dense<0.000000e+00> : vector<8x256xf32>
    %72 = tpu.matmul %71, %12, %cst_38 {dimension_numbers = #tpu.dot_dimension_numbers<[1], [0], [0], [1], [0, 0, 1, 1], [], []>} : vector<8x4xf32>, vector<4x256xf32>, vector<8x256xf32> -> vector<8x256xf32>
    %73 = arith.addf %70, %72 : vector<8x256xf32>
    %c1_i32 = arith.constant 1 : i32
    %74 = tpu.dynamic_rotate %73 by %c1_i32 dim 1 : vector<8x256xf32>, i32 -> vector<8x256xf32>
    %75 = vector.extract_strided_slice %0 {offsets = [3, 0], sizes = [1, 256], strides = [1, 1]} : vector<9x256xf32> to vector<1x256xf32>
    %76 = vector.broadcast %75 : vector<1x256xf32> to vector<8x256xf32>
    %77 = arith.mulf %74, %76 : vector<8x256xf32>
    %78 = arith.addf %62, %77 : vector<8x256xf32>
    %79 = vector.extract_strided_slice %15 {offsets = [0, 64], sizes = [8, 4], strides = [1, 1]} : vector<8x144xf32> to vector<8x4xf32>
    %cst_39 = arith.constant dense<0.000000e+00> : vector<8x256xf32>
    %80 = tpu.matmul %79, %4, %cst_39 {dimension_numbers = #tpu.dot_dimension_numbers<[1], [0], [0], [1], [0, 0, 1, 1], [], []>} : vector<8x4xf32>, vector<4x256xf32>, vector<8x256xf32> -> vector<8x256xf32>
    %81 = vector.extract_strided_slice %15 {offsets = [0, 68], sizes = [8, 4], strides = [1, 1]} : vector<8x144xf32> to vector<8x4xf32>
    %cst_40 = arith.constant dense<0.000000e+00> : vector<8x256xf32>
    %82 = tpu.matmul %81, %14, %cst_40 {dimension_numbers = #tpu.dot_dimension_numbers<[1], [0], [0], [1], [0, 0, 1, 1], [], []>} : vector<8x4xf32>, vector<4x256xf32>, vector<8x256xf32> -> vector<8x256xf32>
    %83 = arith.addf %80, %82 : vector<8x256xf32>
    %84 = vector.extract_strided_slice %15 {offsets = [0, 72], sizes = [8, 4], strides = [1, 1]} : vector<8x144xf32> to vector<8x4xf32>
    %cst_41 = arith.constant dense<0.000000e+00> : vector<8x256xf32>
    %85 = tpu.matmul %84, %8, %cst_41 {dimension_numbers = #tpu.dot_dimension_numbers<[1], [0], [0], [1], [0, 0, 1, 1], [], []>} : vector<8x4xf32>, vector<4x256xf32>, vector<8x256xf32> -> vector<8x256xf32>
    %86 = arith.addf %83, %85 : vector<8x256xf32>
    %87 = vector.extract_strided_slice %15 {offsets = [0, 76], sizes = [8, 4], strides = [1, 1]} : vector<8x144xf32> to vector<8x4xf32>
    %cst_42 = arith.constant dense<0.000000e+00> : vector<8x256xf32>
    %88 = tpu.matmul %87, %12, %cst_42 {dimension_numbers = #tpu.dot_dimension_numbers<[1], [0], [0], [1], [0, 0, 1, 1], [], []>} : vector<8x4xf32>, vector<4x256xf32>, vector<8x256xf32> -> vector<8x256xf32>
    %89 = arith.addf %86, %88 : vector<8x256xf32>
    %90 = arith.addf %78, %89 : vector<8x256xf32>
    %91 = vector.extract_strided_slice %15 {offsets = [0, 80], sizes = [8, 4], strides = [1, 1]} : vector<8x144xf32> to vector<8x4xf32>
    %cst_43 = arith.constant dense<0.000000e+00> : vector<8x256xf32>
    %92 = tpu.matmul %91, %4, %cst_43 {dimension_numbers = #tpu.dot_dimension_numbers<[1], [0], [0], [1], [0, 0, 1, 1], [], []>} : vector<8x4xf32>, vector<4x256xf32>, vector<8x256xf32> -> vector<8x256xf32>
    %93 = vector.extract_strided_slice %15 {offsets = [0, 84], sizes = [8, 4], strides = [1, 1]} : vector<8x144xf32> to vector<8x4xf32>
    %cst_44 = arith.constant dense<0.000000e+00> : vector<8x256xf32>
    %94 = tpu.matmul %93, %14, %cst_44 {dimension_numbers = #tpu.dot_dimension_numbers<[1], [0], [0], [1], [0, 0, 1, 1], [], []>} : vector<8x4xf32>, vector<4x256xf32>, vector<8x256xf32> -> vector<8x256xf32>
    %95 = arith.addf %92, %94 : vector<8x256xf32>
    %96 = vector.extract_strided_slice %15 {offsets = [0, 88], sizes = [8, 4], strides = [1, 1]} : vector<8x144xf32> to vector<8x4xf32>
    %cst_45 = arith.constant dense<0.000000e+00> : vector<8x256xf32>
    %97 = tpu.matmul %96, %8, %cst_45 {dimension_numbers = #tpu.dot_dimension_numbers<[1], [0], [0], [1], [0, 0, 1, 1], [], []>} : vector<8x4xf32>, vector<4x256xf32>, vector<8x256xf32> -> vector<8x256xf32>
    %98 = arith.addf %95, %97 : vector<8x256xf32>
    %99 = vector.extract_strided_slice %15 {offsets = [0, 92], sizes = [8, 4], strides = [1, 1]} : vector<8x144xf32> to vector<8x4xf32>
    %cst_46 = arith.constant dense<0.000000e+00> : vector<8x256xf32>
    %100 = tpu.matmul %99, %12, %cst_46 {dimension_numbers = #tpu.dot_dimension_numbers<[1], [0], [0], [1], [0, 0, 1, 1], [], []>} : vector<8x4xf32>, vector<4x256xf32>, vector<8x256xf32> -> vector<8x256xf32>
    %101 = arith.addf %98, %100 : vector<8x256xf32>
    %c255_i32 = arith.constant 255 : i32
    %102 = tpu.dynamic_rotate %101 by %c255_i32 dim 1 : vector<8x256xf32>, i32 -> vector<8x256xf32>
    %103 = vector.extract_strided_slice %0 {offsets = [5, 0], sizes = [1, 256], strides = [1, 1]} : vector<9x256xf32> to vector<1x256xf32>
    %104 = vector.broadcast %103 : vector<1x256xf32> to vector<8x256xf32>
    %105 = arith.mulf %102, %104 : vector<8x256xf32>
    %106 = arith.addf %90, %105 : vector<8x256xf32>
    %107 = vector.extract_strided_slice %15 {offsets = [0, 96], sizes = [8, 4], strides = [1, 1]} : vector<8x144xf32> to vector<8x4xf32>
    %cst_47 = arith.constant dense<0.000000e+00> : vector<8x256xf32>
    %108 = tpu.matmul %107, %4, %cst_47 {dimension_numbers = #tpu.dot_dimension_numbers<[1], [0], [0], [1], [0, 0, 1, 1], [], []>} : vector<8x4xf32>, vector<4x256xf32>, vector<8x256xf32> -> vector<8x256xf32>
    %109 = vector.extract_strided_slice %15 {offsets = [0, 100], sizes = [8, 4], strides = [1, 1]} : vector<8x144xf32> to vector<8x4xf32>
    %cst_48 = arith.constant dense<0.000000e+00> : vector<8x256xf32>
    %110 = tpu.matmul %109, %14, %cst_48 {dimension_numbers = #tpu.dot_dimension_numbers<[1], [0], [0], [1], [0, 0, 1, 1], [], []>} : vector<8x4xf32>, vector<4x256xf32>, vector<8x256xf32> -> vector<8x256xf32>
    %111 = arith.addf %108, %110 : vector<8x256xf32>
    %112 = vector.extract_strided_slice %15 {offsets = [0, 104], sizes = [8, 4], strides = [1, 1]} : vector<8x144xf32> to vector<8x4xf32>
    %cst_49 = arith.constant dense<0.000000e+00> : vector<8x256xf32>
    %113 = tpu.matmul %112, %8, %cst_49 {dimension_numbers = #tpu.dot_dimension_numbers<[1], [0], [0], [1], [0, 0, 1, 1], [], []>} : vector<8x4xf32>, vector<4x256xf32>, vector<8x256xf32> -> vector<8x256xf32>
    %114 = arith.addf %111, %113 : vector<8x256xf32>
    %115 = vector.extract_strided_slice %15 {offsets = [0, 108], sizes = [8, 4], strides = [1, 1]} : vector<8x144xf32> to vector<8x4xf32>
    %cst_50 = arith.constant dense<0.000000e+00> : vector<8x256xf32>
    %116 = tpu.matmul %115, %12, %cst_50 {dimension_numbers = #tpu.dot_dimension_numbers<[1], [0], [0], [1], [0, 0, 1, 1], [], []>} : vector<8x4xf32>, vector<4x256xf32>, vector<8x256xf32> -> vector<8x256xf32>
    %117 = arith.addf %114, %116 : vector<8x256xf32>
    %c241_i32 = arith.constant 241 : i32
    %118 = tpu.dynamic_rotate %117 by %c241_i32 dim 1 : vector<8x256xf32>, i32 -> vector<8x256xf32>
    %119 = vector.extract_strided_slice %0 {offsets = [6, 0], sizes = [1, 256], strides = [1, 1]} : vector<9x256xf32> to vector<1x256xf32>
    %120 = vector.broadcast %119 : vector<1x256xf32> to vector<8x256xf32>
    %121 = arith.mulf %118, %120 : vector<8x256xf32>
    %122 = arith.addf %106, %121 : vector<8x256xf32>
    %123 = vector.extract_strided_slice %15 {offsets = [0, 112], sizes = [8, 4], strides = [1, 1]} : vector<8x144xf32> to vector<8x4xf32>
    %cst_51 = arith.constant dense<0.000000e+00> : vector<8x256xf32>
    %124 = tpu.matmul %123, %4, %cst_51 {dimension_numbers = #tpu.dot_dimension_numbers<[1], [0], [0], [1], [0, 0, 1, 1], [], []>} : vector<8x4xf32>, vector<4x256xf32>, vector<8x256xf32> -> vector<8x256xf32>
    %125 = vector.extract_strided_slice %15 {offsets = [0, 116], sizes = [8, 4], strides = [1, 1]} : vector<8x144xf32> to vector<8x4xf32>
    %cst_52 = arith.constant dense<0.000000e+00> : vector<8x256xf32>
    %126 = tpu.matmul %125, %14, %cst_52 {dimension_numbers = #tpu.dot_dimension_numbers<[1], [0], [0], [1], [0, 0, 1, 1], [], []>} : vector<8x4xf32>, vector<4x256xf32>, vector<8x256xf32> -> vector<8x256xf32>
    %127 = arith.addf %124, %126 : vector<8x256xf32>
    %128 = vector.extract_strided_slice %15 {offsets = [0, 120], sizes = [8, 4], strides = [1, 1]} : vector<8x144xf32> to vector<8x4xf32>
    %cst_53 = arith.constant dense<0.000000e+00> : vector<8x256xf32>
    %129 = tpu.matmul %128, %8, %cst_53 {dimension_numbers = #tpu.dot_dimension_numbers<[1], [0], [0], [1], [0, 0, 1, 1], [], []>} : vector<8x4xf32>, vector<4x256xf32>, vector<8x256xf32> -> vector<8x256xf32>
    %130 = arith.addf %127, %129 : vector<8x256xf32>
    %131 = vector.extract_strided_slice %15 {offsets = [0, 124], sizes = [8, 4], strides = [1, 1]} : vector<8x144xf32> to vector<8x4xf32>
    %cst_54 = arith.constant dense<0.000000e+00> : vector<8x256xf32>
    %132 = tpu.matmul %131, %12, %cst_54 {dimension_numbers = #tpu.dot_dimension_numbers<[1], [0], [0], [1], [0, 0, 1, 1], [], []>} : vector<8x4xf32>, vector<4x256xf32>, vector<8x256xf32> -> vector<8x256xf32>
    %133 = arith.addf %130, %132 : vector<8x256xf32>
    %c240_i32 = arith.constant 240 : i32
    %134 = tpu.dynamic_rotate %133 by %c240_i32 dim 1 : vector<8x256xf32>, i32 -> vector<8x256xf32>
    %135 = vector.extract_strided_slice %0 {offsets = [7, 0], sizes = [1, 256], strides = [1, 1]} : vector<9x256xf32> to vector<1x256xf32>
    %136 = vector.broadcast %135 : vector<1x256xf32> to vector<8x256xf32>
    %137 = arith.mulf %134, %136 : vector<8x256xf32>
    %138 = arith.addf %122, %137 : vector<8x256xf32>
    %139 = vector.extract_strided_slice %15 {offsets = [0, 128], sizes = [8, 4], strides = [1, 1]} : vector<8x144xf32> to vector<8x4xf32>
    %cst_55 = arith.constant dense<0.000000e+00> : vector<8x256xf32>
    %140 = tpu.matmul %139, %4, %cst_55 {dimension_numbers = #tpu.dot_dimension_numbers<[1], [0], [0], [1], [0, 0, 1, 1], [], []>} : vector<8x4xf32>, vector<4x256xf32>, vector<8x256xf32> -> vector<8x256xf32>
    %141 = vector.extract_strided_slice %15 {offsets = [0, 132], sizes = [8, 4], strides = [1, 1]} : vector<8x144xf32> to vector<8x4xf32>
    %cst_56 = arith.constant dense<0.000000e+00> : vector<8x256xf32>
    %142 = tpu.matmul %141, %14, %cst_56 {dimension_numbers = #tpu.dot_dimension_numbers<[1], [0], [0], [1], [0, 0, 1, 1], [], []>} : vector<8x4xf32>, vector<4x256xf32>, vector<8x256xf32> -> vector<8x256xf32>
    %143 = arith.addf %140, %142 : vector<8x256xf32>
    %144 = vector.extract_strided_slice %15 {offsets = [0, 136], sizes = [8, 4], strides = [1, 1]} : vector<8x144xf32> to vector<8x4xf32>
    %cst_57 = arith.constant dense<0.000000e+00> : vector<8x256xf32>
    %145 = tpu.matmul %144, %8, %cst_57 {dimension_numbers = #tpu.dot_dimension_numbers<[1], [0], [0], [1], [0, 0, 1, 1], [], []>} : vector<8x4xf32>, vector<4x256xf32>, vector<8x256xf32> -> vector<8x256xf32>
    %146 = arith.addf %143, %145 : vector<8x256xf32>
    %147 = vector.extract_strided_slice %15 {offsets = [0, 140], sizes = [8, 4], strides = [1, 1]} : vector<8x144xf32> to vector<8x4xf32>
    %cst_58 = arith.constant dense<0.000000e+00> : vector<8x256xf32>
    %148 = tpu.matmul %147, %12, %cst_58 {dimension_numbers = #tpu.dot_dimension_numbers<[1], [0], [0], [1], [0, 0, 1, 1], [], []>} : vector<8x4xf32>, vector<4x256xf32>, vector<8x256xf32> -> vector<8x256xf32>
    %149 = arith.addf %146, %148 : vector<8x256xf32>
    %c239_i32 = arith.constant 239 : i32
    %150 = tpu.dynamic_rotate %149 by %c239_i32 dim 1 : vector<8x256xf32>, i32 -> vector<8x256xf32>
    %151 = vector.extract_strided_slice %0 {offsets = [8, 0], sizes = [1, 256], strides = [1, 1]} : vector<9x256xf32> to vector<1x256xf32>
    %152 = vector.broadcast %151 : vector<1x256xf32> to vector<8x256xf32>
    %153 = arith.mulf %150, %152 : vector<8x256xf32>
    %154 = arith.addf %138, %153 : vector<8x256xf32>
    %cst_59 = arith.constant dense<0.000000e+00> : vector<8xf32>
    %155 = vector.multi_reduction <add>, %154, %cst_59 [1] : vector<8x256xf32> to vector<8xf32>
    %156 = vector.shape_cast %155 : vector<8xf32> to vector<8x1xf32>
    %cst_60 = arith.constant 2.560000e+02 : f32
    %157 = vector.broadcast %cst_60 : f32 to vector<8x1xf32>
    %158 = arith.divf %156, %157 : vector<8x1xf32>
    %159 = vector.broadcast %158 : vector<8x1xf32> to vector<8x256xf32>
    %160 = arith.subf %154, %159 : vector<8x256xf32>
    %161 = arith.mulf %160, %160 : vector<8x256xf32>
    %cst_61 = arith.constant dense<0.000000e+00> : vector<8xf32>
    %162 = vector.multi_reduction <add>, %161, %cst_61 [1] : vector<8x256xf32> to vector<8xf32>
    %163 = vector.shape_cast %162 : vector<8xf32> to vector<8x1xf32>
    %cst_62 = arith.constant 2.560000e+02 : f32
    %164 = vector.broadcast %cst_62 : f32 to vector<8x1xf32>
    %165 = arith.divf %163, %164 : vector<8x1xf32>
    %cst_63 = arith.constant 9.99999974E-6 : f32
    %166 = vector.broadcast %cst_63 : f32 to vector<8x1xf32>
    %167 = arith.addf %165, %166 : vector<8x1xf32>
    %168 = math.rsqrt %167 : vector<8x1xf32>
    %169 = vector.broadcast %168 : vector<8x1xf32> to vector<8x256xf32>
    %170 = arith.mulf %160, %169 : vector<8x256xf32>
    %cst_64 = arith.constant 5.000000e-01 : f32
    %171 = vector.broadcast %cst_64 : f32 to vector<8x256xf32>
    %172 = arith.mulf %171, %170 : vector<8x256xf32>
    %cst_65 = arith.constant 0.707106769 : f32
    %173 = vector.broadcast %cst_65 : f32 to vector<8x256xf32>
    %174 = arith.mulf %170, %173 : vector<8x256xf32>
    %175 = math.erf %174 : vector<8x256xf32>
    %cst_66 = arith.constant 1.000000e+00 : f32
    %176 = vector.broadcast %cst_66 : f32 to vector<8x256xf32>
    %177 = arith.addf %176, %175 : vector<8x256xf32>
    %178 = arith.mulf %172, %177 : vector<8x256xf32>
    %c0_67 = arith.constant 0 : index
    %c0_68 = arith.constant 0 : index
    %179 = vector.load %arg10[%c0_67, %c0_68] : memref<8x72xf32, #tpu.memory_space<vmem>>, vector<8x72xf32>
    %180 = vector.extract_strided_slice %179 {offsets = [0, 0], sizes = [8, 8], strides = [1, 1]} : vector<8x72xf32> to vector<8x8xf32>
    %cst_69 = arith.constant dense<0.000000e+00> : vector<8x256xf32>
    %181 = tpu.matmul %180, %178, %cst_69 {dimension_numbers = #tpu.dot_dimension_numbers<[1], [0], [0], [1], [0, 0, 1, 1], [], []>} : vector<8x8xf32>, vector<8x256xf32>, vector<8x256xf32> -> vector<8x256xf32>
    %c17_i32_70 = arith.constant 17 : i32
    %182 = tpu.dynamic_rotate %181 by %c17_i32_70 dim 1 : vector<8x256xf32>, i32 -> vector<8x256xf32>
    %183 = vector.extract_strided_slice %0 {offsets = [0, 0], sizes = [1, 256], strides = [1, 1]} : vector<9x256xf32> to vector<1x256xf32>
    %184 = vector.broadcast %183 : vector<1x256xf32> to vector<8x256xf32>
    %185 = arith.mulf %182, %184 : vector<8x256xf32>
    %186 = vector.extract_strided_slice %179 {offsets = [0, 8], sizes = [8, 8], strides = [1, 1]} : vector<8x72xf32> to vector<8x8xf32>
    %cst_71 = arith.constant dense<0.000000e+00> : vector<8x256xf32>
    %187 = tpu.matmul %186, %178, %cst_71 {dimension_numbers = #tpu.dot_dimension_numbers<[1], [0], [0], [1], [0, 0, 1, 1], [], []>} : vector<8x8xf32>, vector<8x256xf32>, vector<8x256xf32> -> vector<8x256xf32>
    %c16_i32_72 = arith.constant 16 : i32
    %188 = tpu.dynamic_rotate %187 by %c16_i32_72 dim 1 : vector<8x256xf32>, i32 -> vector<8x256xf32>
    %189 = vector.extract_strided_slice %0 {offsets = [1, 0], sizes = [1, 256], strides = [1, 1]} : vector<9x256xf32> to vector<1x256xf32>
    %190 = vector.broadcast %189 : vector<1x256xf32> to vector<8x256xf32>
    %191 = arith.mulf %188, %190 : vector<8x256xf32>
    %192 = arith.addf %185, %191 : vector<8x256xf32>
    %193 = vector.extract_strided_slice %179 {offsets = [0, 16], sizes = [8, 8], strides = [1, 1]} : vector<8x72xf32> to vector<8x8xf32>
    %cst_73 = arith.constant dense<0.000000e+00> : vector<8x256xf32>
    %194 = tpu.matmul %193, %178, %cst_73 {dimension_numbers = #tpu.dot_dimension_numbers<[1], [0], [0], [1], [0, 0, 1, 1], [], []>} : vector<8x8xf32>, vector<8x256xf32>, vector<8x256xf32> -> vector<8x256xf32>
    %c15_i32_74 = arith.constant 15 : i32
    %195 = tpu.dynamic_rotate %194 by %c15_i32_74 dim 1 : vector<8x256xf32>, i32 -> vector<8x256xf32>
    %196 = vector.extract_strided_slice %0 {offsets = [2, 0], sizes = [1, 256], strides = [1, 1]} : vector<9x256xf32> to vector<1x256xf32>
    %197 = vector.broadcast %196 : vector<1x256xf32> to vector<8x256xf32>
    %198 = arith.mulf %195, %197 : vector<8x256xf32>
    %199 = arith.addf %192, %198 : vector<8x256xf32>
    %200 = vector.extract_strided_slice %179 {offsets = [0, 24], sizes = [8, 8], strides = [1, 1]} : vector<8x72xf32> to vector<8x8xf32>
    %cst_75 = arith.constant dense<0.000000e+00> : vector<8x256xf32>
    %201 = tpu.matmul %200, %178, %cst_75 {dimension_numbers = #tpu.dot_dimension_numbers<[1], [0], [0], [1], [0, 0, 1, 1], [], []>} : vector<8x8xf32>, vector<8x256xf32>, vector<8x256xf32> -> vector<8x256xf32>
    %c1_i32_76 = arith.constant 1 : i32
    %202 = tpu.dynamic_rotate %201 by %c1_i32_76 dim 1 : vector<8x256xf32>, i32 -> vector<8x256xf32>
    %203 = vector.extract_strided_slice %0 {offsets = [3, 0], sizes = [1, 256], strides = [1, 1]} : vector<9x256xf32> to vector<1x256xf32>
    %204 = vector.broadcast %203 : vector<1x256xf32> to vector<8x256xf32>
    %205 = arith.mulf %202, %204 : vector<8x256xf32>
    %206 = arith.addf %199, %205 : vector<8x256xf32>
    %207 = vector.extract_strided_slice %179 {offsets = [0, 32], sizes = [8, 8], strides = [1, 1]} : vector<8x72xf32> to vector<8x8xf32>
    %cst_77 = arith.constant dense<0.000000e+00> : vector<8x256xf32>
    %208 = tpu.matmul %207, %178, %cst_77 {dimension_numbers = #tpu.dot_dimension_numbers<[1], [0], [0], [1], [0, 0, 1, 1], [], []>} : vector<8x8xf32>, vector<8x256xf32>, vector<8x256xf32> -> vector<8x256xf32>
    %209 = arith.addf %206, %208 : vector<8x256xf32>
    %210 = vector.extract_strided_slice %179 {offsets = [0, 40], sizes = [8, 8], strides = [1, 1]} : vector<8x72xf32> to vector<8x8xf32>
    %cst_78 = arith.constant dense<0.000000e+00> : vector<8x256xf32>
    %211 = tpu.matmul %210, %178, %cst_78 {dimension_numbers = #tpu.dot_dimension_numbers<[1], [0], [0], [1], [0, 0, 1, 1], [], []>} : vector<8x8xf32>, vector<8x256xf32>, vector<8x256xf32> -> vector<8x256xf32>
    %c255_i32_79 = arith.constant 255 : i32
    %212 = tpu.dynamic_rotate %211 by %c255_i32_79 dim 1 : vector<8x256xf32>, i32 -> vector<8x256xf32>
    %213 = vector.extract_strided_slice %0 {offsets = [5, 0], sizes = [1, 256], strides = [1, 1]} : vector<9x256xf32> to vector<1x256xf32>
    %214 = vector.broadcast %213 : vector<1x256xf32> to vector<8x256xf32>
    %215 = arith.mulf %212, %214 : vector<8x256xf32>
    %216 = arith.addf %209, %215 : vector<8x256xf32>
    %217 = vector.extract_strided_slice %179 {offsets = [0, 48], sizes = [8, 8], strides = [1, 1]} : vector<8x72xf32> to vector<8x8xf32>
    %cst_80 = arith.constant dense<0.000000e+00> : vector<8x256xf32>
    %218 = tpu.matmul %217, %178, %cst_80 {dimension_numbers = #tpu.dot_dimension_numbers<[1], [0], [0], [1], [0, 0, 1, 1], [], []>} : vector<8x8xf32>, vector<8x256xf32>, vector<8x256xf32> -> vector<8x256xf32>
    %c241_i32_81 = arith.constant 241 : i32
    %219 = tpu.dynamic_rotate %218 by %c241_i32_81 dim 1 : vector<8x256xf32>, i32 -> vector<8x256xf32>
    %220 = vector.extract_strided_slice %0 {offsets = [6, 0], sizes = [1, 256], strides = [1, 1]} : vector<9x256xf32> to vector<1x256xf32>
    %221 = vector.broadcast %220 : vector<1x256xf32> to vector<8x256xf32>
    %222 = arith.mulf %219, %221 : vector<8x256xf32>
    %223 = arith.addf %216, %222 : vector<8x256xf32>
    %224 = vector.extract_strided_slice %179 {offsets = [0, 56], sizes = [8, 8], strides = [1, 1]} : vector<8x72xf32> to vector<8x8xf32>
    %cst_82 = arith.constant dense<0.000000e+00> : vector<8x256xf32>
    %225 = tpu.matmul %224, %178, %cst_82 {dimension_numbers = #tpu.dot_dimension_numbers<[1], [0], [0], [1], [0, 0, 1, 1], [], []>} : vector<8x8xf32>, vector<8x256xf32>, vector<8x256xf32> -> vector<8x256xf32>
    %c240_i32_83 = arith.constant 240 : i32
    %226 = tpu.dynamic_rotate %225 by %c240_i32_83 dim 1 : vector<8x256xf32>, i32 -> vector<8x256xf32>
    %227 = vector.extract_strided_slice %0 {offsets = [7, 0], sizes = [1, 256], strides = [1, 1]} : vector<9x256xf32> to vector<1x256xf32>
    %228 = vector.broadcast %227 : vector<1x256xf32> to vector<8x256xf32>
    %229 = arith.mulf %226, %228 : vector<8x256xf32>
    %230 = arith.addf %223, %229 : vector<8x256xf32>
    %231 = vector.extract_strided_slice %179 {offsets = [0, 64], sizes = [8, 8], strides = [1, 1]} : vector<8x72xf32> to vector<8x8xf32>
    %cst_84 = arith.constant dense<0.000000e+00> : vector<8x256xf32>
    %232 = tpu.matmul %231, %178, %cst_84 {dimension_numbers = #tpu.dot_dimension_numbers<[1], [0], [0], [1], [0, 0, 1, 1], [], []>} : vector<8x8xf32>, vector<8x256xf32>, vector<8x256xf32> -> vector<8x256xf32>
    %c239_i32_85 = arith.constant 239 : i32
    %233 = tpu.dynamic_rotate %232 by %c239_i32_85 dim 1 : vector<8x256xf32>, i32 -> vector<8x256xf32>
    %234 = vector.extract_strided_slice %0 {offsets = [8, 0], sizes = [1, 256], strides = [1, 1]} : vector<9x256xf32> to vector<1x256xf32>
    %235 = vector.broadcast %234 : vector<1x256xf32> to vector<8x256xf32>
    %236 = arith.mulf %233, %235 : vector<8x256xf32>
    %237 = arith.addf %230, %236 : vector<8x256xf32>
    %cst_86 = arith.constant dense<0.000000e+00> : vector<8xf32>
    %238 = vector.multi_reduction <add>, %237, %cst_86 [1] : vector<8x256xf32> to vector<8xf32>
    %239 = vector.shape_cast %238 : vector<8xf32> to vector<8x1xf32>
    %cst_87 = arith.constant 2.560000e+02 : f32
    %240 = vector.broadcast %cst_87 : f32 to vector<8x1xf32>
    %241 = arith.divf %239, %240 : vector<8x1xf32>
    %242 = vector.broadcast %241 : vector<8x1xf32> to vector<8x256xf32>
    %243 = arith.subf %237, %242 : vector<8x256xf32>
    %244 = arith.mulf %243, %243 : vector<8x256xf32>
    %cst_88 = arith.constant dense<0.000000e+00> : vector<8xf32>
    %245 = vector.multi_reduction <add>, %244, %cst_88 [1] : vector<8x256xf32> to vector<8xf32>
    %246 = vector.shape_cast %245 : vector<8xf32> to vector<8x1xf32>
    %cst_89 = arith.constant 2.560000e+02 : f32
    %247 = vector.broadcast %cst_89 : f32 to vector<8x1xf32>
    %248 = arith.divf %246, %247 : vector<8x1xf32>
    %cst_90 = arith.constant 9.99999974E-6 : f32
    %249 = vector.broadcast %cst_90 : f32 to vector<8x1xf32>
    %250 = arith.addf %248, %249 : vector<8x1xf32>
    %251 = math.rsqrt %250 : vector<8x1xf32>
    %252 = vector.broadcast %251 : vector<8x1xf32> to vector<8x256xf32>
    %253 = arith.mulf %243, %252 : vector<8x256xf32>
    %cst_91 = arith.constant 5.000000e-01 : f32
    %254 = vector.broadcast %cst_91 : f32 to vector<8x256xf32>
    %255 = arith.mulf %254, %253 : vector<8x256xf32>
    %cst_92 = arith.constant 0.707106769 : f32
    %256 = vector.broadcast %cst_92 : f32 to vector<8x256xf32>
    %257 = arith.mulf %253, %256 : vector<8x256xf32>
    %258 = math.erf %257 : vector<8x256xf32>
    %cst_93 = arith.constant 1.000000e+00 : f32
    %259 = vector.broadcast %cst_93 : f32 to vector<8x256xf32>
    %260 = arith.addf %259, %258 : vector<8x256xf32>
    %261 = arith.mulf %255, %260 : vector<8x256xf32>
    %c0_94 = arith.constant 0 : index
    %c0_95 = arith.constant 0 : index
    %c0_96 = arith.constant 0 : index
    %262 = vector.load %arg11[%c0_94, %c0_95, %c0_96] : memref<1x8x256xf32, #tpu.memory_space<vmem>>, vector<1x8x256xf32>
    %263 = vector.shape_cast %262 : vector<1x8x256xf32> to vector<8x256xf32>
    %264 = vector.shape_cast %261 : vector<8x256xf32> to vector<1x8x256xf32>
    tpu.vector_store %arg11[%c0_94, %c0_95, %c0_96], %264 {strides = array<i32>} : memref<1x8x256xf32, #tpu.memory_space<vmem>>, vector<1x8x256xf32>,
    return
  }
  func.func @transform_0(%arg0: i32) -> (i32, i32) {
    %c0_i32 = arith.constant 0 : i32
    %c0_i32_0 = arith.constant 0 : i32
    %c0_i32_1 = arith.constant 0 : i32
    return %c0_i32, %c0_i32_0 : i32, i32
  }
  func.func @transform_1(%arg0: i32) -> (i32, i32, i32) {
    %c0_i32 = arith.constant 0 : i32
    %c0_i32_0 = arith.constant 0 : i32
    %c0_i32_1 = arith.constant 0 : i32
    return %arg0, %c0_i32, %c0_i32_0 : i32, i32, i32
  }
  func.func @transform_2(%arg0: i32) -> (i32, i32, i32) {
    %c0_i32 = arith.constant 0 : i32
    %c0_i32_0 = arith.constant 0 : i32
    %c0_i32_1 = arith.constant 0 : i32
    return %arg0, %c0_i32, %c0_i32_0 : i32, i32, i32
  }
  func.func @transform_3(%arg0: i32) -> (i32, i32, i32) {
    %c0_i32 = arith.constant 0 : i32
    %c0_i32_0 = arith.constant 0 : i32
    %c0_i32_1 = arith.constant 0 : i32
    return %arg0, %c0_i32, %c0_i32_0 : i32, i32, i32
  }
  func.func @transform_4(%arg0: i32) -> (i32, i32, i32) {
    %c0_i32 = arith.constant 0 : i32
    %c0_i32_0 = arith.constant 0 : i32
    %c0_i32_1 = arith.constant 0 : i32
    return %arg0, %c0_i32, %c0_i32_0 : i32, i32, i32
  }
  func.func @transform_5(%arg0: i32) -> (i32, i32) {
    %c0_i32 = arith.constant 0 : i32
    %c0_i32_0 = arith.constant 0 : i32
    %c0_i32_1 = arith.constant 0 : i32
    return %c0_i32, %c0_i32_0 : i32, i32
  }
  func.func @transform_6(%arg0: i32) -> (i32, i32) {
    %c0_i32 = arith.constant 0 : i32
    %c0_i32_0 = arith.constant 0 : i32
    %c0_i32_1 = arith.constant 0 : i32
    return %c0_i32, %c0_i32_0 : i32, i32
  }
  func.func @transform_7(%arg0: i32) -> (i32, i32) {
    %c0_i32 = arith.constant 0 : i32
    %c0_i32_0 = arith.constant 0 : i32
    %c0_i32_1 = arith.constant 0 : i32
    return %c0_i32, %c0_i32_0 : i32, i32
  }
  func.func @transform_8(%arg0: i32) -> (i32, i32) {
    %c0_i32 = arith.constant 0 : i32
    %c0_i32_0 = arith.constant 0 : i32
    %c0_i32_1 = arith.constant 0 : i32
    return %c0_i32, %c0_i32_0 : i32, i32
  }
  func.func @transform_9(%arg0: i32) -> (i32, i32) {
    %c0_i32 = arith.constant 0 : i32
    %c0_i32_0 = arith.constant 0 : i32
    %c0_i32_1 = arith.constant 0 : i32
    return %c0_i32, %c0_i32_0 : i32, i32
  }
  func.func @transform_10(%arg0: i32) -> (i32, i32, i32) {
    %c0_i32 = arith.constant 0 : i32
    %c0_i32_0 = arith.constant 0 : i32
    %c0_i32_1 = arith.constant 0 : i32
    return %arg0, %c0_i32, %c0_i32_0 : i32, i32, i32
  }
}

</mosaic_0001>

<bundles_post_ra>
// kernel: dino_multi2single_scale.1
= control target key start
LH: loop header
LB: loop body
LE: loop exit
PB: predicated region body
PF: predicated region fallthrough
CT: control target
= control target key end

     0   :  { %15 = vsyncpa [#allocation3], 0  ;;  %s5682_s13 = smov 0   ;;  %s6365_s0 = inlined_call_operand.vmem [shape: f32[9,256], index: 0, kind: input, shape index: {}]   ;;  %s6366_s1 = inlined_call_operand.vmem [shape: f32[2,4,1024], index: 1, kind: input, shape index: {}]   ;;  %s6367_s2 = inlined_call_operand.vmem [shape: f32[2,4,256], index: 2, kind: input, shape index: {}]   ;;  %s6368_s3 = inlined_call_operand.vmem [shape: f32[2,4,64], index: 3, kind: input, shape index: {}]   ;;  %s6369_s4 = inlined_call_operand.vmem [shape: f32[2,4,16], index: 4, kind: input, shape index: {}]   ;;  %s6370_s5 = inlined_call_operand.hbm [shape: f32[1024,256], index: 5, kind: input, shape index: {}]   ;;  %s6371_s6 = inlined_call_operand.vmem [shape: f32[64,256], index: 6, kind: input, shape index: {}]   ;;  %s6372_s7 = inlined_call_operand.vmem [shape: f32[16,256], index: 7, kind: input, shape index: {}]   ;;  %s6373_s8 = inlined_call_operand.vmem [shape: f32[8,144], index: 8, kind: input, shape index: {}]   ;;  %s6374_s9 = inlined_call_operand.vmem [shape: f32[8,72], index: 9, kind: input, shape index: {}]   ;;  %s6375_s10 = inlined_call_operand.vmem [shape: f32[2,8,256], index: 10, kind: output, shape index: {}]  }
   0x1 LB: > { %s5688_s14 = sadd.s32 4294967295, %s5584_s13   ;;  %p4994_p0 = scmp.ge.s32.totalorder %s5584_s13, 1  ;;  %s5584_s13 = sphi %s5682_s13, %s21_s13  }
   0x2   : > { %p282_p1 = scmp.lt.s32.totalorder %s5584_s13, 3  ;;  %s5586_s15 = smov [#allocation2]  }
   0x3   : > { %s297_s16 = sshll.u32 %s5586_s15, 4  ;;  %p6376_p3 = scmp.eq.s32.totalorder %s5688_s14, 0  ;;  %s298_s16 = int_to_ptr.vmem [resolvable:$true] %s297_s16 }
   0x4   : > { %p5692_p2 = pnand %p4994_p0, %p282_p1  ;;  %s5546_s21 = scalar_lea.hbm %s6370_s5, 32768 }
   0x5   : > { %p5547_p6 = scmp.ne.s32.totalorder %s6370_s5, %s5546_s21  ;;  %p5553_p10 = scmp.lt.u32.totalorder %s5546_s21, %s6370_s5 }
   0x6   : > { %s6379_s17 = scalar_select %p5692_p2, 1, 0 }
   0x7   : > { %p5473_p4 = pneg %p5692_p2 }
   0x9   : > { %p5701_p5 = pnand %p6376_p3, %p5473_p4 }
   0xb   : > { %p5548_p7 = pneg %p5701_p5 }
   0xd   : > { %p5549_p8 = pnand %p5548_p7, %p5547_p6 }
   0xf   : > { %p5550_p9 = pneg %p5549_p8 }
  0x11   : > { %p5555_p11 = pnand %p5553_p10, %p5550_p9 }
  0x13   : > { %5558 = shalt.err (!%p5555_p11)
}
  0x14   : > { %s5559_s26 = scalar_lea.vmem %s298_s16, 32768  ;;  %p5567_p1 = scmp.lt.s32.totalorder %s298_s16, %s298_s16 }
  0x15   : > { %p5560_p12 = scmp.ne.s32.totalorder %s298_s16, %s5559_s26  ;;  %p5568_p4 = scmp.lt.s32.totalorder %s5559_s26, %s5559_s26 }
  0x17   : > { %p5562_p13 = pnand %p5560_p12, %p5548_p7  ;;  %p5569_p3 = por %p5568_p4, %p5567_p1 }
  0x19   : > { %p5563_p0 = pneg %p5562_p13 }
  0x1b   : > { %p5570_p2 = pnand %p5569_p3, %p5563_p0 }
  0x1d   : > { %5573 = shalt.err (!%p5570_p2)
}
  0x1e   : > { %s5587_s27 = smov 256   ;;  %s5588_s28 = smov 16  }
  0x1f   : > { %5476 = dma.hbm_to_vmem [thread:$0]  (!%p5701_p5), %s6370_s5, 32768, %s298_s16, [#allocation3], %s5587_s27, %s5587_s27, %s5588_s28  }
  0x20   : > { %p6381_p6 = scmp.ne.s32.totalorder %s6379_s17, 0 }
  0x21   : > { %p6382_p8 = scmp.eq.s32.totalorder (!%p6381_p6), %s5688_s14, 0 }
  0x22   : > { %355 = sbr.rel (%p6381_p6) target bundleno = 2115 (0x843), region = 60 }
  0x29   : > { %5579 = dma.done.wait (%p6382_p8), [#allocation3], 32768   ;;  %p6383_p7 = pmov %p6382_p8 }
  0x2a   : > { %v438_v0 = vld [vmem:[#allocation2 + $0x8] sm:$0xff]  ;;  %v440_v1 = vld [vmem:[#allocation2 + $0x18] sm:$0xff]  ;;  %v437_v2 = vld [vmem:[#allocation2] sm:$0xff]  ;;  %p406_p2 = scmp.lt.s32.totalorder %s5688_s14, 1  ;;  %vm1006_vm0 = vcmask 523264   ;;  %s5590_s21 = smov 124  }
  0x2b   : > { %5581 = vsyncadd (%p6383_p7), [#allocation3], 4294934528  ;;  %v5133_v3 = vpack.c.bf16 %v440_v1, %v438_v0  ;;  %v439_v4 = vld [vmem:[#allocation2 + $0x10] sm:$0xff]  ;;  %v442_v5 = vld [vmem:[#allocation2 + $0x28] sm:$0xff]  ;;  %s5591_s22 = smov 116   ;;  %vm1172_vm1 = vcmask 1043456  }
  0x2c   : > { %v444_v6 = vld [vmem:[#allocation2 + $0x38] sm:$0xff]  ;;  %v5135_v7 = vpack.c.bf16 %v439_v4, %v437_v2  ;;  %v441_v9 = vld [vmem:[#allocation2 + $0x20] sm:$0xff]  ;;  %v443_v10 = vld [vmem:[#allocation2 + $0x30] sm:$0xff]  ;;  %s6386_s14 = smov (!%p406_p2, %s5688_s14), 1  ;;  %vm1086_vm2 = vcmask 130048   ;;  %s5593_s24 = smov 108  }
  0x2d   : > { %v5137_v8 = vpack.c.bf16 %v444_v6, %v442_v5  ;;  %v446_v11 = vld [vmem:[#allocation2 + $0x48] sm:$0xff]  ;;  %5134 = vmatprep.subr.bf16.mxu0 %v5133_v3  ;;  %v448_v12 = vld [vmem:[#allocation2 + $0x58] sm:$0xff]  ;;  %v5139_v13 = vpack.c.bf16 %v443_v10, %v441_v9  ;;  %v445_v15 = vld [vmem:[#allocation2 + $0x40] sm:$0xff]  ;;  %s5130_s11 = sshll.u32 %s6386_s14, 5  ;;  %s5131_s15 = sshll.u32 %s6386_s14, 3  ;;  %vm1169_vm3 = vcmask 31744  }
  0x2e   : > { %5136 = vmatpush1.bf16.msra.mxu0 %v5135_v7  ;;  %v5141_v14 = vpack.c.bf16 %v448_v12, %v446_v11  ;;  %v447_v16 = vld [vmem:[#allocation2 + $0x50] sm:$0xff]  ;;  %v450_v17 = vld [vmem:[#allocation2 + $0x68] sm:$0xff]  ;;  %v452_v18 = vld [vmem:[#allocation2 + $0x78] sm:$0xff]  ;;  %s5735_s16 = scalar_lea.vmem %s6366_s1, %s5130_s11  ;;  %s5785_s23 = scalar_lea.vmem %s6367_s2, %s5131_s15  ;;  %vm4106_vm12 = vcmask 64512  }
  0x2f   : > { %5138 = vmatprep.subr.bf16.mxu0 %v5137_v8  ;;  %v5143_v19 = vpack.c.bf16 %v447_v16, %v445_v15  ;;  %v5145_v20 = vpack.c.bf16 %v452_v18, %v450_v17  ;;  %v449_v21 = vld [vmem:[#allocation2 + $0x60] sm:$0xff]  ;;  %v451_v22 = vld [vmem:[#allocation2 + $0x70] sm:$0xff]  ;;  %v454_v23 = vld [vmem:[#allocation2 + $0x88] sm:$0xff]  ;;  %s5003_s19 = sshll.u32 %s6386_s14, 2  ;;  %s5595_s26 = smov 104  }
  0x30   : > { %v456_v24 = vld [vmem:[#allocation2 + $0x98] sm:$0xff]  ;;  %v5147_v25 = vpack.c.bf16 %v451_v22, %v449_v21  ;;  %v453_v27 = vld [vmem:[#allocation2 + $0x80] sm:$0xff]  ;;  %v455_v28 = vld [vmem:[#allocation2 + $0x90] sm:$0xff]  ;;  %s419_s25 = scalar_lea.vmem %s6368_s3, %s5003_s19  ;;  %s423_s20 = scalar_lea.vmem %s6369_s4, %s5003_s19 }
  0x31   : > { %v5149_v26 = vpack.c.bf16 %v456_v24, %v454_v23  ;;  %v458_v29 = vld [vmem:[#allocation2 + $0xa8] sm:$0xff]  ;;  %v460_v30 = vld [vmem:[#allocation2 + $0xb8] sm:$0xff]  ;;  %v5151_v31 = vpack.c.bf16 %v455_v28, %v453_v27  ;;  %v457_v33 = vld [vmem:[#allocation2 + $0xa0] sm:$0xff]  ;;  %s5592_s19 = smov 120   ;;  %s5596_s27 = smov 100  }
  0x32   : > { %5140 = vmatpush1.bf16.msra.mxu0 %v5139_v13  ;;  %v5153_v32 = vpack.c.bf16 %v460_v30, %v458_v29  ;;  %v459_v34 = vld [vmem:[#allocation2 + $0xb0] sm:$0xff]  ;;  %v462_v35 = vld [vmem:[#allocation2 + $0xc8] sm:$0xff]  ;;  %v464_v36 = vld [vmem:[#allocation2 + $0xd8] sm:$0xff]  ;;  %s5597_s28 = smov 92   ;;  %s5598_s29 = smov 96  }
  0x33   : > { %5142 = vmatprep.subr.bf16.mxu0 %v5141_v14  ;;  %v5155_v37 = vpack.c.bf16 %v459_v34, %v457_v33  ;;  %v5157_v38 = vpack.c.bf16 %v464_v36, %v462_v35  ;;  %v461_v39 = vld [vmem:[#allocation2 + $0xc0] sm:$0xff]  ;;  %v463_v40 = vld [vmem:[#allocation2 + $0xd0] sm:$0xff]  ;;  %v466_v42 = vld [vmem:[#allocation2 + $0xe8] sm:$0xff]  ;;  %s5599_s30 = smov 88   ;;  %s5600_s11 = smov 84  }
  0x34   : > { %v5738_v41 = vld [vmem:[%s5735_s16] sm:$0xff]  ;;  %v468_v43 = vld [vmem:[#allocation2 + $0xf8] sm:$0xff]  ;;  %v5159_v45 = vpack.c.bf16 %v463_v40, %v461_v39  ;;  %v467_v48 = vld [vmem:[#allocation2 + $0xf0] sm:$0xff]  ;;  %s5601_s12 = smov 76   ;;  %s5602_s15 = smov 80  }
  0x35   : > { %v697_v44 = vcombine.high %v5738_v41, %v5738_v41  ;;  %v5161_v46 = vpack.c.bf16 %v468_v43, %v466_v42  ;;  %v465_v47 = vld [vmem:[#allocation2 + $0xe0] sm:$0xff]  ;;  %v470_v49 = vld [vmem:[#allocation2 + $0x108] sm:$0xff]  ;;  %v472_v50 = vld [vmem:[#allocation2 + $0x118] sm:$0xff]  ;;  %s5603_s17 = smov 72   ;;  %s5604_s18 = smov 68  }
  0x36   : > { %5144 = vmatpush1.bf16.msra.mxu0 %v5143_v19  ;;  %v5163_v51 = vpack.c.bf16 %v467_v48, %v465_v47  ;;  %v5165_v52 = vpack.c.bf16 %v472_v50, %v470_v49  ;;  %v469_v53 = vld [vmem:[#allocation2 + $0x100] sm:$0xff]  ;;  %v471_v54 = vld [vmem:[#allocation2 + $0x110] sm:$0xff]  ;;  %v474_v55 = vld [vmem:[#allocation2 + $0x128] sm:$0xff] }
  0x37   : > { %5146 = vmatprep.subr.bf16.mxu0 %v5145_v20  ;;  %769 = vmatprep.mubr.f32.mxu0 %v697_v44  ;;  %v476_v56 = vld [vmem:[#allocation2 + $0x138] sm:$0xff]  ;;  %v5167_v57 = vpack.c.bf16 %v471_v54, %v469_v53  ;;  %v473_v59 = vld [vmem:[#allocation2 + $0x120] sm:$0xff]  ;;  %v475_v60 = vld [vmem:[#allocation2 + $0x130] sm:$0xff] }
  0x38   : > { %v5169_v58 = vpack.c.bf16 %v476_v56, %v474_v55  ;;  %v478_v61 = vld [vmem:[#allocation2 + $0x148] sm:$0xff]  ;;  %v480_v62 = vld [vmem:[#allocation2 + $0x158] sm:$0xff]  ;;  %v5171_v63 = vpack.c.bf16 %v475_v60, %v473_v59  ;;  %v477_v1 = vld [vmem:[#allocation2 + $0x140] sm:$0xff] }
  0x39   : > { %v5173_v0 = vpack.c.bf16 %v480_v62, %v478_v61  ;;  %v479_v2 = vld [vmem:[#allocation2 + $0x150] sm:$0xff]  ;;  %v482_v3 = vld [vmem:[#allocation2 + $0x168] sm:$0xff]  ;;  %v484_v4 = vld [vmem:[#allocation2 + $0x178] sm:$0xff] }
  0x3a   : > { %5148 = vmatpush1.bf16.msra.mxu0 %v5147_v25  ;;  %v5175_v5 = vpack.c.bf16 %v479_v2, %v477_v1  ;;  %v5177_v6 = vpack.c.bf16 %v484_v4, %v482_v3  ;;  %v481_v7 = vld [vmem:[#allocation2 + $0x160] sm:$0xff]  ;;  %v483_v8 = vld [vmem:[#allocation2 + $0x170] sm:$0xff]  ;;  %v486_v9 = vld [vmem:[#allocation2 + $0x188] sm:$0xff] }
  0x3b   : > { %5150 = vmatprep.subr.bf16.mxu0 %v5149_v26  ;;  %v488_v10 = vld [vmem:[#allocation2 + $0x198] sm:$0xff]  ;;  %v5179_v11 = vpack.c.bf16 %v483_v8, %v481_v7  ;;  %v485_v13 = vld [vmem:[#allocation2 + $0x180] sm:$0xff]  ;;  %v487_v14 = vld [vmem:[#allocation2 + $0x190] sm:$0xff] }
  0x3c   : > { %v5181_v12 = vpack.c.bf16 %v488_v10, %v486_v9  ;;  %v490_v15 = vld [vmem:[#allocation2 + $0x1a8] sm:$0xff]  ;;  %v492_v16 = vld [vmem:[#allocation2 + $0x1b8] sm:$0xff]  ;;  %v5183_v17 = vpack.c.bf16 %v487_v14, %v485_v13  ;;  %v489_v19 = vld [vmem:[#allocation2 + $0x1a0] sm:$0xff] }
  0x3d   : > { %v5185_v18 = vpack.c.bf16 %v492_v16, %v490_v15  ;;  %v491_v20 = vld [vmem:[#allocation2 + $0x1b0] sm:$0xff]  ;;  %v494_v21 = vld [vmem:[#allocation2 + $0x1c8] sm:$0xff]  ;;  %v496_v22 = vld [vmem:[#allocation2 + $0x1d8] sm:$0xff] }
  0x3e   : > { %5152 = vmatpush1.bf16.msra.mxu0 %v5151_v31  ;;  %v5187_v23 = vpack.c.bf16 %v491_v20, %v489_v19  ;;  %v5189_v24 = vpack.c.bf16 %v496_v22, %v494_v21  ;;  %v493_v25 = vld [vmem:[#allocation2 + $0x1c0] sm:$0xff]  ;;  %v495_v26 = vld [vmem:[#allocation2 + $0x1d0] sm:$0xff]  ;;  %v498_v27 = vld [vmem:[#allocation2 + $0x1e8] sm:$0xff] }
  0x3f   : > { %5154 = vmatprep.subr.bf16.mxu0 %v5153_v32  ;;  %v500_v28 = vld [vmem:[#allocation2 + $0x1f8] sm:$0xff]  ;;  %v5191_v29 = vpack.c.bf16 %v495_v26, %v493_v25  ;;  %v497_v31 = vld [vmem:[#allocation2 + $0x1e0] sm:$0xff]  ;;  %v499_v32 = vld [vmem:[#allocation2 + $0x1f0] sm:$0xff] }
  0x40   : > { %v5193_v30 = vpack.c.bf16 %v500_v28, %v498_v27  ;;  %v502_v33 = vld [vmem:[#allocation2 + $0x208] sm:$0xff]  ;;  %v504_v34 = vld [vmem:[#allocation2 + $0x218] sm:$0xff]  ;;  %v5195_v35 = vpack.c.bf16 %v499_v32, %v497_v31  ;;  %v507_v47 = vld [vmem:[#allocation2 + $0x230] sm:$0xff] }
  0x41   : > { %v5197_v36 = vpack.c.bf16 %v504_v34, %v502_v33  ;;  %v5743_v39 = vld [vmem:[%s5735_s16 + $0x8] sm:$0xff]  ;;  %v508_v42 = vld [vmem:[#allocation2 + $0x238] sm:$0xff]  ;;  %v511_v53 = vld [vmem:[#allocation2 + $0x250] sm:$0xff] }
  0x42   : > { %5156 = vmatpush1.bf16.msra.mxu0 %v5155_v37  ;;  %v501_v37 = vld [vmem:[#allocation2 + $0x200] sm:$0xff]  ;;  %v506_v40 = vld [vmem:[#allocation2 + $0x228] sm:$0xff]  ;;  %v698_v44 = vcombine.high %v5743_v39, %v5743_v39  ;;  %v512_v49 = vld [vmem:[#allocation2 + $0x258] sm:$0xff] }
  0x43   : > { %5158 = vmatprep.subr.bf16.mxu0 %v5157_v38  ;;  %v503_v38 = vld [vmem:[#allocation2 + $0x210] sm:$0xff]  ;;  %v510_v48 = vld [vmem:[#allocation2 + $0x248] sm:$0xff]  ;;  %v516_v55 = vld [vmem:[#allocation2 + $0x278] sm:$0xff] }
  0x44   : > { %v5199_v43 = vpack.c.bf16 %v503_v38, %v501_v37  ;;  %v514_v54 = vld [vmem:[#allocation2 + $0x268] sm:$0xff]  ;;  %v515_v59 = vld [vmem:[#allocation2 + $0x270] sm:$0xff]  ;;  %v520_v61 = vld [vmem:[#allocation2 + $0x298] sm:$0xff] }
  0x45   : > { %v518_v60 = vld [vmem:[#allocation2 + $0x288] sm:$0xff]  ;;  %v524_v2 = vld [vmem:[#allocation2 + $0x2b8] sm:$0xff] }
  0x46   : > { %5160 = vmatpush1.bf16.msra.mxu0 %v5159_v45  ;;  %v5201_v45 = vpack.c.bf16 %v508_v42, %v506_v40  ;;  %v522_v1 = vld [vmem:[#allocation2 + $0x2a8] sm:$0xff]  ;;  %v528_v8 = vld [vmem:[#allocation2 + $0x2d8] sm:$0xff] }
  0x47   : > { %5162 = vmatprep.subr.bf16.mxu0 %v5161_v46  ;;  %v505_v46 = vld [vmem:[#allocation2 + $0x220] sm:$0xff]  ;;  %v5217_v4 = vpack.c.bf16 %v524_v2, %v522_v1  ;;  %v526_v7 = vld [vmem:[#allocation2 + $0x2c8] sm:$0xff]  ;;  %v532_v14 = vld [vmem:[#allocation2 + $0x2f8] sm:$0xff] }
  0x48   : > { %v5203_v50 = vpack.c.bf16 %v507_v47, %v505_v46  ;;  %v5221_v10 = vpack.c.bf16 %v528_v8, %v526_v7  ;;  %v530_v13 = vld [vmem:[#allocation2 + $0x2e8] sm:$0xff]  ;;  %v536_v20 = vld [vmem:[#allocation2 + $0x318] sm:$0xff]  ;;  %v561_v8 = vld [vmem:[#allocation2 + $0x3e0] sm:$0xff] }
  0x49   : > { %v5225_v16 = vpack.c.bf16 %v532_v14, %v530_v13  ;;  %v534_v19 = vld [vmem:[#allocation2 + $0x308] sm:$0xff]  ;;  %v540_v26 = vld [vmem:[#allocation2 + $0x338] sm:$0xff] }
  0x4a   : > { %5164 = vmatpush1.bf16.msra.mxu0 %v5163_v51  ;;  %v5205_v51 = vpack.c.bf16 %v512_v49, %v510_v48  ;;  %v5229_v22 = vpack.c.bf16 %v536_v20, %v534_v19  ;;  %v538_v25 = vld [vmem:[#allocation2 + $0x328] sm:$0xff]  ;;  %v544_v32 = vld [vmem:[#allocation2 + $0x358] sm:$0xff]  ;;  %v549_v49 = vld [vmem:[#allocation2 + $0x380] sm:$0xff] }
  0x4b   : > { %5166 = vmatprep.subr.bf16.mxu0 %v5165_v52  ;;  %v509_v52 = vld [vmem:[#allocation2 + $0x240] sm:$0xff]  ;;  %v5233_v28 = vpack.c.bf16 %v540_v26, %v538_v25  ;;  %v542_v31 = vld [vmem:[#allocation2 + $0x348] sm:$0xff]  ;;  %v548_v38 = vld [vmem:[#allocation2 + $0x378] sm:$0xff] }
  0x4c   : > { %v5207_v56 = vpack.c.bf16 %v511_v53, %v509_v52  ;;  %v5237_v34 = vpack.c.bf16 %v544_v32, %v542_v31  ;;  %v546_v37 = vld [vmem:[#allocation2 + $0x368] sm:$0xff]  ;;  %v552_v46 = vld [vmem:[#allocation2 + $0x398] sm:$0xff] }
  0x4d   : > { %v5241_v42 = vpack.c.bf16 %v548_v38, %v546_v37  ;;  %v556_v52 = vld [vmem:[#allocation2 + $0x3b8] sm:$0xff]  ;;  %v999_v25 = vld [vmem:[%s6371_s6 + $0x48] sm:$0xff]  ;;  %v5796_v37 = vld [vmem:[%s5785_s23] sm:$0xff] }
  0x4e   : > { %5168 = vmatpush1.bf16.msra.mxu0 %v5167_v57  ;;  %v5209_v57 = vpack.c.bf16 %v516_v55, %v514_v54  ;;  %v553_v55 = vld [vmem:[#allocation2 + $0x3a0] sm:$0xff]  ;;  %v993_v1 = vld [vmem:[%s6371_s6 + $0x18] sm:$0xff] }
  0x4f   : > { %5170 = vmatprep.subr.bf16.mxu0 %v5169_v58  ;;  %v513_v58 = vld [vmem:[#allocation2 + $0x260] sm:$0xff]  ;;  %v997_v13 = vld [vmem:[%s6371_s6 + $0x38] sm:$0xff] }
  0x50   : > { %v5211_v62 = vpack.c.bf16 %v515_v59, %v513_v58  ;;  %v560_v58 = vld [vmem:[#allocation2 + $0x3d8] sm:$0xff] }
  0x51   : > { %v1001_v26 = vld [vmem:[%s6371_s6 + $0x58] sm:$0xff] }
  0x52   : > { %5172 = vmatpush1.bf16.msra.mxu0 %v5171_v63  ;;  %v517_v63 = vld [vmem:[#allocation2 + $0x280] sm:$0xff]  ;;  %v576_v38 = vld [vmem:[#allocation2 + $0x458] sm:$0xff] }
  0x53   : > { %5174 = vmatprep.subr.bf16.mxu0 %v5173_v0  ;;  %v519_v0 = vld [vmem:[#allocation2 + $0x290] sm:$0xff] }
  0x54   : > { %v5215_v3 = vpack.c.bf16 %v519_v0, %v517_v63  ;;  %v564_v63 = vld [vmem:[#allocation2 + $0x3f8] sm:$0xff]  ;;  %v991_v0 = vld [vmem:[%s6371_s6 + $0x8] sm:$0xff] }
  0x55   : > { %v5389_v2 = vpack.c.bf16 %v993_v1, %v991_v0  ;;  %v579_v0 = vld [vmem:[#allocation2 + $0x470] sm:$0xff]  ;;  %v582_v1 = vld [vmem:[#allocation2 + $0x488] sm:$0xff] }
  0x56   : > { %5176 = vmatpush1.bf16.msra.mxu0 %v5175_v5  ;;  %v521_v5 = vld [vmem:[#allocation2 + $0x2a0] sm:$0xff] }
  0x57   : > { %5178 = vmatprep.subr.bf16.mxu0 %v5177_v6  ;;  %v523_v6 = vld [vmem:[#allocation2 + $0x2b0] sm:$0xff]  ;;  %5390 = vmatprep.subr.bf16.mxu1 %v5389_v2  ;;  %v584_v2 = vld [vmem:[#allocation2 + $0x498] sm:$0xff] }
  0x58   : > { %v5219_v9 = vpack.c.bf16 %v523_v6, %v521_v5 }
  0x5a   : > { %5180 = vmatpush1.bf16.msra.mxu0 %v5179_v11  ;;  %v525_v11 = vld [vmem:[#allocation2 + $0x2c0] sm:$0xff] }
  0x5b   : > { %5182 = vmatprep.subr.bf16.mxu0 %v5181_v12  ;;  %v527_v12 = vld [vmem:[#allocation2 + $0x2d0] sm:$0xff] }
  0x5c   : > { %v5223_v15 = vpack.c.bf16 %v527_v12, %v525_v11  ;;  %v568_v11 = vld [vmem:[#allocation2 + $0x418] sm:$0xff]  ;;  %v995_v12 = vld [vmem:[%s6371_s6 + $0x28] sm:$0xff] }
  0x5d   : > { %v5393_v14 = vpack.c.bf16 %v997_v13, %v995_v12  ;;  %v585_v12 = vld [vmem:[#allocation2 + $0x4a0] sm:$0xff]  ;;  %v587_v13 = vld [vmem:[#allocation2 + $0x4b0] sm:$0xff] }
  0x5e   : > { %5184 = vmatpush1.bf16.msra.mxu0 %v5183_v17  ;;  %v529_v17 = vld [vmem:[#allocation2 + $0x2e0] sm:$0xff] }
  0x5f   : > { %5186 = vmatprep.subr.bf16.mxu0 %v5185_v18  ;;  %v531_v18 = vld [vmem:[#allocation2 + $0x2f0] sm:$0xff] }
  0x60   : > { %v5227_v21 = vpack.c.bf16 %v531_v18, %v529_v17  ;;  %v565_v18 = vld [vmem:[#allocation2 + $0x400] sm:$0xff] }
  0x62   : > { %5188 = vmatpush1.bf16.msra.mxu0 %v5187_v23  ;;  %v533_v23 = vld [vmem:[#allocation2 + $0x300] sm:$0xff] }
  0x63   : > { %5190 = vmatprep.subr.bf16.mxu0 %v5189_v24  ;;  %v535_v24 = vld [vmem:[#allocation2 + $0x310] sm:$0xff] }
  0x64   : > { %v5231_v27 = vpack.c.bf16 %v535_v24, %v533_v23  ;;  %v5774_v23 = vld [vmem:[%s5735_s16 + $0x10] sm:$0xff]  ;;  %v572_v24 = vld [vmem:[#allocation2 + $0x438] sm:$0xff] }
  0x65   : > { %v699_v31 = vcombine.high %v5774_v23, %v5774_v23 }
  0x66   : > { %5192 = vmatpush1.bf16.msra.mxu0 %v5191_v29  ;;  %v537_v29 = vld [vmem:[#allocation2 + $0x320] sm:$0xff] }
  0x67   : > { %5194 = vmatprep.subr.bf16.mxu0 %v5193_v30  ;;  %v539_v30 = vld [vmem:[#allocation2 + $0x330] sm:$0xff] }
  0x68   : > { %v5235_v33 = vpack.c.bf16 %v539_v30, %v537_v29  ;;  %v1000_v29 = vld [vmem:[%s6371_s6 + $0x50] sm:$0xff] }
  0x6a   : > { %5196 = vmatpush1.bf16.msra.mxu0 %v5195_v35  ;;  %v541_v35 = vld [vmem:[#allocation2 + $0x340] sm:$0xff] }
  0x6b   : > { %5198 = vmatprep.subr.bf16.mxu0 %v5197_v36  ;;  %v543_v36 = vld [vmem:[#allocation2 + $0x350] sm:$0xff] }
  0x6c   : > { %v5239_v40 = vpack.c.bf16 %v543_v36, %v541_v35  ;;  %v571_v35 = vld [vmem:[#allocation2 + $0x430] sm:$0xff]  ;;  %v574_v36 = vld [vmem:[#allocation2 + $0x448] sm:$0xff] }
  0x6d   : > { %770 = vmatmul.mubr.f32.vlgmr.msra.gmra.mrb[0].mxu0 %v5738_v41  ;;  %v5213_v41 = vpack.c.bf16 %v520_v61, %v518_v60  ;;  %v557_v61 = vld [vmem:[#allocation2 + $0x3c0] sm:$0xff] }
  0x6e   : > { %5200 = vmatpush1.bf16.msra.mxu0 %v5199_v43  ;;  %840 = vmatprep.mubr.f32.mxu0 %v698_v44  ;;  %v545_v43 = vld [vmem:[#allocation2 + $0x360] sm:$0xff]  ;;  %v547_v44 = vld [vmem:[#allocation2 + $0x370] sm:$0xff] }
  0x6f   : > { %5202 = vmatprep.subr.bf16.mxu0 %v5201_v45  ;;  %v550_v45 = vld [vmem:[#allocation2 + $0x388] sm:$0xff]  ;;  %v5243_v47 = vpack.c.bf16 %v547_v44, %v545_v43  ;;  %v1002_v44 = vld [vmem:[%s6371_s6 + $0x60] sm:$0xff] }
  0x70   : > { %v5245_v48 = vpack.c.bf16 %v552_v46, %v550_v45  ;;  %v1004_v45 = vld [vmem:[%s6371_s6 + $0x70] sm:$0xff]  ;;  %v1083_v46 = vld [vmem:[%s6372_s7 + $0x8] sm:$0xff] }
  0x72   : > { %5204 = vmatpush1.bf16.msra.mxu0 %v5203_v50  ;;  %v551_v50 = vld [vmem:[#allocation2 + $0x390] sm:$0xff] }
  0x73   : > { %5206 = vmatprep.subr.bf16.mxu0 %v5205_v51  ;;  %v554_v51 = vld [vmem:[#allocation2 + $0x3a8] sm:$0xff]  ;;  %v5247_v53 = vpack.c.bf16 %v551_v50, %v549_v49  ;;  %v1082_v49 = vld [vmem:[%s6372_s7] sm:$0xff]  ;;  %v1084_v50 = vld [vmem:[%s6372_s7 + $0x10] sm:$0xff] }
  0x74   : > { %v5249_v54 = vpack.c.bf16 %v556_v52, %v554_v51  ;;  %v5269_v51 = vpack.c.bf16 %v576_v38, %v574_v36  ;;  %v573_v52 = vld [vmem:[#allocation2 + $0x440] sm:$0xff] }
  0x75   : > { %v601_v38 = vld [vmem:[#allocation2 + $0x520] sm:$0xff] }
  0x76   : > { %5208 = vmatpush1.bf16.msra.mxu0 %v5207_v56  ;;  %v555_v56 = vld [vmem:[#allocation2 + $0x3b0] sm:$0xff] }
  0x77   : > { %5210 = vmatprep.subr.bf16.mxu0 %v5209_v57  ;;  %v558_v57 = vld [vmem:[#allocation2 + $0x3c8] sm:$0xff]  ;;  %v5251_v59 = vpack.c.bf16 %v555_v56, %v553_v55  ;;  %v5830_v55 = vld [vmem:[%s6373_s8] sm:$0xff] }
  0x78   : > { %v5253_v60 = vpack.c.bf16 %v560_v58, %v558_v57  ;;  %v578_v56 = vld [vmem:[#allocation2 + $0x468] sm:$0xff]  ;;  %v580_v57 = vld [vmem:[#allocation2 + $0x478] sm:$0xff]  ;;  %v5589_v58 = vmov 0.0   ;;  %1165 = vrot.lane.b32.xlu0 %v5830_v55, %s5590_s21  ;;  %1410 = vrot.lane.b32.xlu1 %v5830_v55, %s5591_s22 }
  0x79   : > { %1074 = vmatprep.mubr.f32.mxu1 %v5589_v58 }
  0x7a   : > { %5212 = vmatpush1.bf16.msra.mxu0 %v5211_v62  ;;  %v559_v62 = vld [vmem:[#allocation2 + $0x3d0] sm:$0xff] }
  0x7b   : > { %5214 = vmatprep.subr.bf16.mxu0 %v5213_v41  ;;  %v562_v41 = vld [vmem:[#allocation2 + $0x3e8] sm:$0xff]  ;;  %v5255_v5 = vpack.c.bf16 %v559_v62, %v557_v61  ;;  %v5840_v61 = vcombine.high %v5796_v37, %v5796_v37 }
  0x7c   : > { %v5257_v7 = vpack.c.bf16 %v564_v63, %v562_v41  ;;  %v5273_v41 = vpack.c.bf16 %v580_v57, %v578_v56  ;;  %v577_v63 = vld [vmem:[#allocation2 + $0x460] sm:$0xff]  ;;  %1327 = vrot.lane.b32.xlu0 %v5830_v55, %s5592_s19  ;;  %1512 = vrot.lane.b32.xlu1 %v5830_v55, %s5593_s24  ;;  %s5607_s24 = smov 56  }
  0x7e   : > { %5216 = vmatpush1.bf16.msra.mxu0 %v5215_v3  ;;  %v990_v3 = vld [vmem:[%s6371_s6] sm:$0xff] }
  0x7f   : > { %5218 = vmatprep.subr.bf16.mxu0 %v5217_v4  ;;  %v992_v4 = vld [vmem:[%s6371_s6 + $0x10] sm:$0xff] }
  0x80   : > { %v5391_v6 = vpack.c.bf16 %v992_v4, %v990_v3  ;;  %v1081_v3 = vld [vmem:[%s423_s20] sm:$0xf]  ;;  %v5275_v4 = vpack.c.bf16 %v579_v0, %v577_v63  ;;  %1662 = vrot.lane.b32.xlu1 %v5830_v55, %s5595_s26  ;;  %s5605_s20 = smov 60  }
  0x82   : > { %5220 = vmatpush1.bf16.msra.mxu0 %v5219_v9  ;;  %v563_v9 = vld [vmem:[#allocation2 + $0x3f0] sm:$0xff]  ;;  %5392 = vmatpush1.bf16.msra.mxu1 %v5391_v6  ;;  %v581_v6 = vld [vmem:[#allocation2 + $0x480] sm:$0xff] }
  0x83   : > { %5222 = vmatprep.subr.bf16.mxu0 %v5221_v10  ;;  %v566_v10 = vld [vmem:[#allocation2 + $0x408] sm:$0xff]  ;;  %v5259_v17 = vpack.c.bf16 %v563_v9, %v561_v8  ;;  %5394 = vmatprep.subr.bf16.mxu1 %v5393_v14  ;;  %v588_v9 = vld [vmem:[#allocation2 + $0x4b8] sm:$0xff] }
  0x84   : > { %v5261_v20 = vpack.c.bf16 %v568_v11, %v566_v10  ;;  %v586_v8 = vld [vmem:[#allocation2 + $0x4a8] sm:$0xff]  ;;  %1835 = vrot.lane.b32.xlu1 %v5830_v55, %s5597_s28  ;;  %s5609_s28 = smov 44  }
  0x85   : > { %v5281_v11 = vpack.c.bf16 %v588_v9, %v586_v8  ;;  %v590_v14 = vld [vmem:[#allocation2 + $0x4c8] sm:$0xff]  ;;  %v623_v8 = vld [vmem:[#allocation2 + $0x5d0] sm:$0xff] }
  0x86   : > { %5224 = vmatpush1.bf16.msra.mxu0 %v5223_v15  ;;  %v994_v15 = vld [vmem:[%s6371_s6 + $0x20] sm:$0xff]  ;;  %v626_v9 = vld [vmem:[#allocation2 + $0x5e8] sm:$0xff] }
  0x87   : > { %5226 = vmatprep.subr.bf16.mxu0 %v5225_v16  ;;  %v996_v16 = vld [vmem:[%s6371_s6 + $0x30] sm:$0xff] }
  0x88   : > { %v5395_v19 = vpack.c.bf16 %v996_v16, %v994_v15  ;;  %v592_v15 = vld [vmem:[#allocation2 + $0x4d8] sm:$0xff]  ;;  %v5283_v16 = vpack.c.bf16 %v587_v13, %v585_v12  ;;  %1985 = vrot.lane.b32.xlu1 %v5830_v55, %s5599_s30  ;;  %v625_v13 = vld [vmem:[#allocation2 + $0x5e0] sm:$0xff] }
  0x8a   : > { %5228 = vmatpush1.bf16.msra.mxu0 %v5227_v21  ;;  %v567_v21 = vld [vmem:[#allocation2 + $0x410] sm:$0xff]  ;;  %5396 = vmatpush1.bf16.msra.mxu1 %v5395_v19 }
  0x8b   : > { %5230 = vmatprep.subr.bf16.mxu0 %v5229_v22  ;;  %v570_v22 = vld [vmem:[#allocation2 + $0x428] sm:$0xff]  ;;  %v5263_v30 = vpack.c.bf16 %v567_v21, %v565_v18  ;;  %v589_v18 = vld [vmem:[#allocation2 + $0x4c0] sm:$0xff]  ;;  %v591_v19 = vld [vmem:[#allocation2 + $0x4d0] sm:$0xff] }
  0x8c   : > { %v596_v21 = vld [vmem:[#allocation2 + $0x4f8] sm:$0xff]  ;;  %2158 = vrot.lane.b32.xlu1 %v5830_v55, %s5601_s12  ;;  %s5611_s12 = smov 40  }
  0x8e   : > { %5232 = vmatpush1.bf16.msra.mxu0 %v5231_v27  ;;  %v5397_v27 = vpack.c.bf16 %v1001_v26, %v999_v25  ;;  %v593_v25 = vld [vmem:[#allocation2 + $0x4e0] sm:$0xff]  ;;  %v595_v26 = vld [vmem:[#allocation2 + $0x4f0] sm:$0xff] }
  0x8f   : > { %5234 = vmatprep.subr.bf16.mxu0 %v5233_v28  ;;  %v998_v28 = vld [vmem:[%s6371_s6 + $0x40] sm:$0xff] }
  0x90   : > { %v5399_v32 = vpack.c.bf16 %v1000_v29, %v998_v28  ;;  %5398 = vmatprep.subr.bf16.mxu1 %v5397_v27  ;;  %v598_v27 = vld [vmem:[#allocation2 + $0x508] sm:$0xff]  ;;  %v600_v28 = vld [vmem:[#allocation2 + $0x518] sm:$0xff]  ;;  %v5291_v29 = vpack.c.bf16 %v595_v26, %v593_v25  ;;  %2308 = vrot.lane.b32.xlu1 %v5830_v55, %s5603_s17 }
  0x92   : > { %5236 = vmatpush1.bf16.msra.mxu0 %v5235_v33  ;;  %v5265_v33 = vpack.c.bf16 %v572_v24, %v570_v22  ;;  %5400 = vmatpush1.bf16.msra.mxu1 %v5399_v32  ;;  %v5287_v22 = vpack.c.bf16 %v591_v19, %v589_v18  ;;  %v599_v32 = vld [vmem:[#allocation2 + $0x510] sm:$0xff]  ;;  %v629_v19 = vld [vmem:[#allocation2 + $0x600] sm:$0xff] }
  0x93   : > { %5238 = vmatprep.subr.bf16.mxu0 %v5237_v34  ;;  %v569_v34 = vld [vmem:[#allocation2 + $0x420] sm:$0xff] }
  0x94   : > { %2481 = vrot.lane.b32.xlu1 %v5830_v55, %s5605_s20  ;;  %s5613_s20 = smov 28  }
  0x96   : > { %5240 = vmatpush1.bf16.msra.mxu0 %v5239_v40  ;;  %v1003_v40 = vld [vmem:[%s6371_s6 + $0x68] sm:$0xff] }
  0x97   : > { %5242 = vmatprep.subr.bf16.mxu0 %v5241_v42  ;;  %v1005_v42 = vld [vmem:[%s6371_s6 + $0x78] sm:$0xff] }
  0x98   : > { %v5401_v43 = vpack.c.bf16 %v1005_v42, %v1003_v40  ;;  %v603_v40 = vld [vmem:[#allocation2 + $0x530] sm:$0xff]  ;;  %v606_v42 = vld [vmem:[#allocation2 + $0x548] sm:$0xff]  ;;  %2631 = vrot.lane.b32.xlu1 %v5830_v55, %s5607_s24  ;;  %s5614_s24 = smov 32  }
  0x9a   : > { %5244 = vmatpush1.bf16.msra.mxu0 %v5243_v47  ;;  %v5267_v47 = vpack.c.bf16 %v571_v35, %v569_v34  ;;  %5402 = vmatprep.subr.bf16.mxu1 %v5401_v43  ;;  %v604_v34 = vld [vmem:[#allocation2 + $0x538] sm:$0xff] }
  0x9b   : > { %5246 = vmatprep.subr.bf16.mxu0 %v5245_v48  ;;  %v5403_v48 = vpack.c.bf16 %v1004_v45, %v1002_v44  ;;  %v608_v43 = vld [vmem:[#allocation2 + $0x558] sm:$0xff]  ;;  %v5299_v44 = vpack.c.bf16 %v603_v40, %v601_v38 }
  0x9c   : > { %v5301_v45 = vpack.c.bf16 %v608_v43, %v606_v42  ;;  %v644_v38 = vld [vmem:[#allocation2 + $0x678] sm:$0xff]  ;;  %v641_v43 = vld [vmem:[#allocation2 + $0x660] sm:$0xff]  ;;  %2787 = vrot.lane.b32.xlu1 %v5830_v55, %s5609_s28  ;;  %s5617_s28 = smov 12  }
  0x9d   : > { %5404 = vmatpush1.bf16.msra.mxu1 %v5403_v48  ;;  %v610_v48 = vld [vmem:[#allocation2 + $0x568] sm:$0xff] }
  0x9e   : > { %5248 = vmatpush1.bf16.msra.mxu0 %v5247_v53  ;;  %v575_v53 = vld [vmem:[#allocation2 + $0x450] sm:$0xff] }
  0x9f   : > { %5250 = vmatprep.subr.bf16.mxu0 %v5249_v54  ;;  %v5271_v62 = vpack.c.bf16 %v575_v53, %v573_v52  ;;  %v611_v52 = vld [vmem:[#allocation2 + $0x570] sm:$0xff]  ;;  %v614_v53 = vld [vmem:[#allocation2 + $0x588] sm:$0xff] }
  0xa0   : > { %2937 = vrot.lane.b32.xlu1 %v5830_v55, %s5611_s12  ;;  %s5619_s12 = smov 8  }
  0xa2   : > { %5252 = vmatpush1.bf16.msra.mxu0 %v5251_v59  ;;  %v989_v59 = vld [vmem:[%s419_s25] sm:$0xf]  ;;  %s5594_s25 = smov 112  }
  0xa3   : > { %5254 = vmatprep.subr.bf16.mxu0 %v5253_v60  ;;  %v5407_v60 = vpack.c.bf16 %v1084_v50, %v1082_v49  ;;  %5007 = vmatmul.mubr.msk.f32.vlgmr.msra.gmra.mrb[0].mxu1 %vm1006_vm0, %v989_v59  ;;  %v613_v59 = vld [vmem:[#allocation2 + $0x580] sm:$0xff] }
  0xa4   : > { %1154 = vmatprep.mubr.f32.mxu1 %v5589_v58  ;;  %1587 = vrot.lane.b32.xlu0 %v5830_v55, %s5594_s25 }
  0xa5   : > { %3110 = vrot.lane.b32.xlu1 %v5830_v55, %s5613_s20 }
  0xa6   : > { %5256 = vmatpush1.bf16.msra.mxu0 %v5255_v5  ;;  %v5277_v5 = vpack.c.bf16 %v584_v2, %v582_v1  ;;  %v617_v1 = vld [vmem:[#allocation2 + $0x5a0] sm:$0xff]  ;;  %v619_v2 = vld [vmem:[#allocation2 + $0x5b0] sm:$0xff] }
  0xa7   : > { %5258 = vmatprep.subr.bf16.mxu0 %v5257_v7  ;;  %v583_v7 = vld [vmem:[#allocation2 + $0x490] sm:$0xff] }
  0xa8   : > { %v5279_v10 = vpack.c.bf16 %v583_v7, %v581_v6  ;;  %1739 = vrot.lane.b32.xlu0 %v5830_v55, %s5596_s27  ;;  %v621_v7 = vld [vmem:[#allocation2 + $0x5c0] sm:$0xff]  ;;  %s5608_s27 = smov 52  }
  0xaa   : > { %5260 = vmatpush1.bf16.msra.mxu0 %v5259_v17  ;;  %v5285_v17 = vpack.c.bf16 %v592_v15, %v590_v14  ;;  %v627_v14 = vld [vmem:[#allocation2 + $0x5f0] sm:$0xff]  ;;  %v630_v15 = vld [vmem:[#allocation2 + $0x608] sm:$0xff] }
  0xab   : > { %5262 = vmatprep.subr.bf16.mxu0 %v5261_v20  ;;  %v594_v20 = vld [vmem:[#allocation2 + $0x4e8] sm:$0xff] }
  0xac   : > { %1910 = vrot.lane.b32.xlu0 %v5830_v55, %s5598_s29  ;;  %v5289_v24 = vpack.c.bf16 %v596_v21, %v594_v20  ;;  %v631_v20 = vld [vmem:[#allocation2 + $0x610] sm:$0xff]  ;;  %v5873_v21 = vld [vmem:[%s5735_s16 + $0x18] sm:$0xff]  ;;  %s6378_s16 = smov 64  }
  0xad   : > { %841 = vmatmul.mubr.f32.vlgmr.msra.gmra.mrb[0].mxu0 %v5743_v39  ;;  %v1085_v39 = vld [vmem:[%s6372_s7 + $0x18] sm:$0xff]  ;;  %v5327_v25 = vpack.c.bf16 %v631_v20, %v629_v19  ;;  %v700_v26 = vcombine.high %v5873_v21, %v5873_v21 }
  0xae   : > { %5264 = vmatpush1.bf16.msra.mxu0 %v5263_v30  ;;  %911 = vmatprep.mubr.f32.mxu0 %v699_v31  ;;  %v5405_v54 = vpack.c.bf16 %v1085_v39, %v1083_v46  ;;  %v5293_v30 = vpack.c.bf16 %v600_v28, %v598_v27  ;;  %v597_v31 = vld [vmem:[#allocation2 + $0x500] sm:$0xff]  ;;  %v612_v39 = vld [vmem:[#allocation2 + $0x578] sm:$0xff] }
  0xaf   : > { %5266 = vmatprep.subr.bf16.mxu0 %v5265_v33  ;;  %v602_v33 = vld [vmem:[#allocation2 + $0x528] sm:$0xff]  ;;  %v5295_v35 = vpack.c.bf16 %v599_v32, %v597_v31  ;;  %v605_v46 = vld [vmem:[#allocation2 + $0x540] sm:$0xff]  ;;  %v5305_v50 = vpack.c.bf16 %v612_v39, %v610_v48  ;;  %v640_v31 = vld [vmem:[#allocation2 + $0x658] sm:$0xff] }
  0xb0   : > { %5406 = vmatprep.subr.bf16.mxu1 %v5405_v54  ;;  %2062 = vrot.lane.b32.xlu0 %v5830_v55, %s5600_s11  ;;  %v5297_v36 = vpack.c.bf16 %v604_v34, %v602_v33  ;;  %v616_v54 = vld [vmem:[#allocation2 + $0x598] sm:$0xff]  ;;  %v633_v28 = vld [vmem:[#allocation2 + $0x620] sm:$0xff]  ;;  %v647_v39 = vld [vmem:[#allocation2 + $0x690] sm:$0xff]  ;;  %s5610_s11 = smov 48  }
  0xb1   : > { %5408 = vmatpush1.bf16.msra.mxu1 %v5407_v60  ;;  %v5309_v57 = vpack.c.bf16 %v616_v54, %v614_v53  ;;  %v615_v60 = vld [vmem:[#allocation2 + $0x590] sm:$0xff]  ;;  %v637_v34 = vld [vmem:[#allocation2 + $0x640] sm:$0xff] }
  0xb2   : > { %5268 = vmatpush1.bf16.msra.mxu0 %v5267_v47  ;;  %5009 = vmatprep.subr.msk.mxu1 %vm1172_vm1, %v5840_v61  ;;  %v607_v47 = vld [vmem:[#allocation2 + $0x550] sm:$0xff]  ;;  %v5311_v63 = vpack.c.bf16 %v615_v60, %v613_v59  ;;  %v645_v48 = vld [vmem:[#allocation2 + $0x680] sm:$0xff] }
  0xb3   : > { %5270 = vmatprep.subr.bf16.mxu0 %v5269_v51  ;;  %v5303_v49 = vpack.c.bf16 %v607_v47, %v605_v46  ;;  %v609_v51 = vld [vmem:[#allocation2 + $0x560] sm:$0xff]  ;;  %v648_v46 = vld [vmem:[#allocation2 + $0x698] sm:$0xff]  ;;  %v651_v54 = vld [vmem:[#allocation2 + $0x6b0] sm:$0xff] }
  0xb4   : > { %5008 = vmatmul.mubr.msk.f32.vlgmr.msra.gmra.mrb[2].mxu1 %vm1086_vm2, %v1081_v3  ;;  %2233 = vrot.lane.b32.xlu0 %v5830_v55, %s5602_s15  ;;  %v5307_v56 = vpack.c.bf16 %v611_v52, %v609_v51  ;;  %v622_v3 = vld [vmem:[#allocation2 + $0x5c8] sm:$0xff]  ;;  %v5343_v51 = vpack.c.bf16 %v647_v39, %v645_v48  ;;  %v649_v53 = vld [vmem:[#allocation2 + $0x6a0] sm:$0xff] }
  0xb5   : > { %5010 = vmatpush1.msk.msra.mxu1 %vm1172_vm1, %v5796_v37  ;;  %1241 = vmatprep.mubr.f32.mxu1 %v5589_v58  ;;  %v5347_v59 = vpack.c.bf16 %v651_v54, %v649_v53  ;;  %v685_v39 = vld [vmem:[#allocation2 + $0x7c0] sm:$0xff] }
  0xb6   : > { %5272 = vmatpush1.bf16.msra.mxu0 %v5271_v62  ;;  %v618_v62 = vld [vmem:[#allocation2 + $0x5a8] sm:$0xff]  ;;  %v689_v54 = vld [vmem:[#allocation2 + $0x7e0] sm:$0xff] }
  0xb7   : > { %5274 = vmatprep.subr.bf16.mxu0 %v5273_v41  ;;  %v620_v41 = vld [vmem:[#allocation2 + $0x5b8] sm:$0xff] }
  0xb8   : > { %2385 = vrot.lane.b32.xlu0 %v5830_v55, %s5604_s18  ;;  %v5313_v0 = vpack.c.bf16 %v620_v41, %v618_v62  ;;  %v653_v62 = vld [vmem:[#allocation2 + $0x6c0] sm:$0xff]  ;;  %v655_v41 = vld [vmem:[#allocation2 + $0x6d0] sm:$0xff]  ;;  %s5612_s18 = smov 36  }
  0xba   : > { %5276 = vmatpush1.bf16.msra.mxu0 %v5275_v4  ;;  %v624_v4 = vld [vmem:[#allocation2 + $0x5d8] sm:$0xff] }
  0xbb   : > { %5278 = vmatprep.subr.bf16.mxu0 %v5277_v5  ;;  %v5315_v5 = vpack.c.bf16 %v619_v2, %v617_v1  ;;  %v5317_v6 = vpack.c.bf16 %v624_v4, %v622_v3  ;;  %v5351_v1 = vpack.c.bf16 %v655_v41, %v653_v62  ;;  %v657_v3 = vld [vmem:[#allocation2 + $0x6e0] sm:$0xff]  ;;  %v659_v4 = vld [vmem:[#allocation2 + $0x6f0] sm:$0xff] }
  0xbc   : > { %2556 = vrot.lane.b32.xlu0 %v5830_v55, %s6378_s16  ;;  %s5615_s16 = smov 24  }
  0xbd   : > { %3260 = vrot.lane.b32.xlu1 %v5830_v55, %s5615_s16  ;;  %s5624_s16 = smov 127  }
  0xbe   : > { %5280 = vmatpush1.bf16.msra.mxu0 %v5279_v10  ;;  %v628_v10 = vld [vmem:[#allocation2 + $0x5f8] sm:$0xff] }
  0xbf   : > { %5282 = vmatprep.subr.bf16.mxu0 %v5281_v11  ;;  %v5319_v11 = vpack.c.bf16 %v623_v8, %v621_v7  ;;  %v5321_v12 = vpack.c.bf16 %v628_v10, %v626_v9  ;;  %v5355_v7 = vpack.c.bf16 %v659_v4, %v657_v3  ;;  %v661_v9 = vld [vmem:[#allocation2 + $0x700] sm:$0xff]  ;;  %v663_v10 = vld [vmem:[#allocation2 + $0x710] sm:$0xff] }
  0xc0   : > { %2708 = vrot.lane.b32.xlu0 %v5830_v55, %s5608_s27  ;;  %s5616_s27 = smov 20  }
  0xc1   : > { %3433 = vrot.lane.b32.xlu1 %v5830_v55, %s5617_s28  ;;  %s5626_s28 = smov 111  }
  0xc2   : > { %5284 = vmatpush1.bf16.msra.mxu0 %v5283_v16  ;;  %v632_v16 = vld [vmem:[#allocation2 + $0x618] sm:$0xff] }
  0xc3   : > { %5286 = vmatprep.subr.bf16.mxu0 %v5285_v17  ;;  %v5323_v17 = vpack.c.bf16 %v627_v14, %v625_v13  ;;  %v5325_v18 = vpack.c.bf16 %v632_v16, %v630_v15  ;;  %v5359_v13 = vpack.c.bf16 %v663_v10, %v661_v9  ;;  %v665_v15 = vld [vmem:[#allocation2 + $0x720] sm:$0xff]  ;;  %v667_v16 = vld [vmem:[#allocation2 + $0x730] sm:$0xff] }
  0xc4   : > { %v5363_v19 = vpack.c.bf16 %v667_v16, %v665_v15  ;;  %2862 = vrot.lane.b32.xlu0 %v5830_v55, %s5610_s11  ;;  %s5618_s11 = smov 16  }
  0xc5   : > { %3583 = vrot.lane.b32.xlu1 %v5830_v55, %s5619_s12 }
  0xc6   : > { %5288 = vmatpush1.bf16.msra.mxu0 %v5287_v22  ;;  %v634_v22 = vld [vmem:[#allocation2 + $0x628] sm:$0xff] }
  0xc7   : > { %5290 = vmatprep.subr.bf16.mxu0 %v5289_v24  ;;  %v636_v24 = vld [vmem:[#allocation2 + $0x638] sm:$0xff] }
  0xc8   : > { %v5329_v27 = vpack.c.bf16 %v636_v24, %v634_v22  ;;  %v669_v22 = vld [vmem:[#allocation2 + $0x740] sm:$0xff]  ;;  %v671_v24 = vld [vmem:[#allocation2 + $0x750] sm:$0xff]  ;;  %3014 = vrot.lane.b32.xlu0 %v5830_v55, %s5612_s18  ;;  %s5620_s18 = smov 4  }
  0xca   : > { %5292 = vmatpush1.bf16.msra.mxu0 %v5291_v29  ;;  %v635_v29 = vld [vmem:[#allocation2 + $0x630] sm:$0xff] }
  0xcb   : > { %5294 = vmatprep.subr.bf16.mxu0 %v5293_v30  ;;  %v638_v30 = vld [vmem:[#allocation2 + $0x648] sm:$0xff]  ;;  %v5331_v32 = vpack.c.bf16 %v635_v29, %v633_v28  ;;  %v673_v29 = vld [vmem:[#allocation2 + $0x760] sm:$0xff] }
  0xcc   : > { %v5333_v33 = vpack.c.bf16 %v640_v31, %v638_v30  ;;  %v675_v30 = vld [vmem:[#allocation2 + $0x770] sm:$0xff]  ;;  %v678_v31 = vld [vmem:[#allocation2 + $0x788] sm:$0xff]  ;;  %3185 = vrot.lane.b32.xlu0 %v5830_v55, %s5614_s24 }
  0xce   : > { %5296 = vmatpush1.bf16.msra.mxu0 %v5295_v35  ;;  %v639_v35 = vld [vmem:[#allocation2 + $0x650] sm:$0xff] }
  0xcf   : > { %5298 = vmatprep.subr.bf16.mxu0 %v5297_v36  ;;  %v642_v36 = vld [vmem:[#allocation2 + $0x668] sm:$0xff]  ;;  %v5335_v40 = vpack.c.bf16 %v639_v35, %v637_v34  ;;  %v677_v35 = vld [vmem:[#allocation2 + $0x780] sm:$0xff] }
  0xd0   : > { %v5337_v42 = vpack.c.bf16 %v644_v38, %v642_v36  ;;  %v679_v36 = vld [vmem:[#allocation2 + $0x790] sm:$0xff]  ;;  %v682_v38 = vld [vmem:[#allocation2 + $0x7a8] sm:$0xff]  ;;  %3337 = vrot.lane.b32.xlu0 %v5830_v55, %s5616_s27  ;;  %s5625_s27 = smov 113  }
  0xd2   : > { %5300 = vmatpush1.bf16.msra.mxu0 %v5299_v44  ;;  %v643_v44 = vld [vmem:[#allocation2 + $0x670] sm:$0xff] }
  0xd3   : > { %5302 = vmatprep.subr.bf16.mxu0 %v5301_v45  ;;  %v646_v45 = vld [vmem:[#allocation2 + $0x688] sm:$0xff]  ;;  %v5339_v47 = vpack.c.bf16 %v643_v44, %v641_v43  ;;  %v681_v44 = vld [vmem:[#allocation2 + $0x7a0] sm:$0xff] }
  0xd4   : > { %3508 = vrot.lane.b32.xlu0 %v5830_v55, %s5618_s11 }
  0xd6   : > { %5304 = vmatpush1.bf16.msra.mxu0 %v5303_v49  ;;  %v650_v49 = vld [vmem:[#allocation2 + $0x6a8] sm:$0xff] }
  0xd7   : > { %5306 = vmatprep.subr.bf16.mxu0 %v5305_v50  ;;  %v652_v50 = vld [vmem:[#allocation2 + $0x6b8] sm:$0xff] }
  0xd8   : > { %v5345_v52 = vpack.c.bf16 %v652_v50, %v650_v49  ;;  %v687_v49 = vld [vmem:[#allocation2 + $0x7d0] sm:$0xff]  ;;  %v690_v50 = vld [vmem:[#allocation2 + $0x7e8] sm:$0xff]  ;;  %3660 = vrot.lane.b32.xlu0 %v5830_v55, %s5620_s18 }
  0xda   : > { %5308 = vmatpush1.bf16.msra.mxu0 %v5307_v56  ;;  %v654_v56 = vld [vmem:[#allocation2 + $0x6c8] sm:$0xff] }
  0xdb   : > { %5310 = vmatprep.subr.bf16.mxu0 %v5309_v57  ;;  %v656_v57 = vld [vmem:[#allocation2 + $0x6d8] sm:$0xff] }
  0xdc   : > { %v5349_v60 = vpack.c.bf16 %v656_v57, %v654_v56  ;;  %v691_v56 = vld [vmem:[#allocation2 + $0x7f0] sm:$0xff] }
  0xde   : > { %5312 = vmatpush1.bf16.msra.mxu0 %v5311_v63  ;;  %v658_v63 = vld [vmem:[#allocation2 + $0x6e8] sm:$0xff] }
  0xdf   : > { %5314 = vmatprep.subr.bf16.mxu0 %v5313_v0  ;;  %v660_v0 = vld [vmem:[#allocation2 + $0x6f8] sm:$0xff] }
  0xe0   : > { %v5353_v2 = vpack.c.bf16 %v660_v0, %v658_v63 }
  0xe2   : > { %5316 = vmatpush1.bf16.msra.mxu0 %v5315_v5  ;;  %v662_v5 = vld [vmem:[#allocation2 + $0x708] sm:$0xff] }
  0xe3   : > { %5318 = vmatprep.subr.bf16.mxu0 %v5317_v6  ;;  %v664_v6 = vld [vmem:[#allocation2 + $0x718] sm:$0xff] }
  0xe4   : > { %v5357_v8 = vpack.c.bf16 %v664_v6, %v662_v5 }
  0xe6   : > { %5320 = vmatpush1.bf16.msra.mxu0 %v5319_v11  ;;  %v666_v11 = vld [vmem:[#allocation2 + $0x728] sm:$0xff] }
  0xe7   : > { %5322 = vmatprep.subr.bf16.mxu0 %v5321_v12  ;;  %v668_v12 = vld [vmem:[#allocation2 + $0x738] sm:$0xff] }
  0xe8   : > { %v5361_v14 = vpack.c.bf16 %v668_v12, %v666_v11 }
  0xea   : > { %5324 = vmatpush1.bf16.msra.mxu0 %v5323_v17  ;;  %v670_v17 = vld [vmem:[#allocation2 + $0x748] sm:$0xff]  ;;  %v1166_v57 = vpop.permute.xlu0 %1165 }
  0xeb   : > { %5326 = vmatprep.subr.bf16.mxu0 %v5325_v18  ;;  %v672_v18 = vld [vmem:[#allocation2 + $0x758] sm:$0xff]  ;;  %5011 = vmatmul.mubr.msk.f32.vlgmr.msra.gmra.mrb[4].mxu1 %vm1169_vm3, %v1166_v57  ;;  %v1497_v57 = vlaneseq }
  0xec   : > { %v5365_v20 = vpack.c.bf16 %v672_v18, %v670_v17  ;;  %1320 = vmatprep.mubr.f32.mxu1 %v5589_v58 }
  0xed   : > { %912 = vmatmul.mubr.f32.vlgmr.msra.gmra.mrb[0].mxu0 %v5774_v23  ;;  %v5341_v23 = vpack.c.bf16 %v648_v46, %v646_v45  ;;  %v683_v45 = vld [vmem:[#allocation2 + $0x7b0] sm:$0xff]  ;;  %v686_v46 = vld [vmem:[#allocation2 + $0x7c8] sm:$0xff] }
  0xee   : > { %5328 = vmatpush1.bf16.msra.mxu0 %v5327_v25  ;;  %982 = vmatprep.mubr.f32.mxu0 %v700_v26  ;;  %v674_v25 = vld [vmem:[#allocation2 + $0x768] sm:$0xff]  ;;  %v676_v26 = vld [vmem:[#allocation2 + $0x778] sm:$0xff] }
  0xef   : > { %5330 = vmatprep.subr.bf16.mxu0 %v5329_v27  ;;  %v5367_v27 = vpack.c.bf16 %v671_v24, %v669_v22  ;;  %v5369_v28 = vpack.c.bf16 %v676_v26, %v674_v25 }
  0xf2   : > { %5332 = vmatpush1.bf16.msra.mxu0 %v5331_v32  ;;  %v680_v32 = vld [vmem:[#allocation2 + $0x798] sm:$0xff] }
  0xf3   : > { %5334 = vmatprep.subr.bf16.mxu0 %v5333_v33  ;;  %v5371_v33 = vpack.c.bf16 %v675_v30, %v673_v29  ;;  %v5373_v34 = vpack.c.bf16 %v680_v32, %v678_v31  ;;  %v5545_v32 = vld [vmem:[%s5785_s23] sm:$0xff]  ;;  %s5621_s23 = smov 17  }
  0xf6   : > { %5336 = vmatpush1.bf16.msra.mxu0 %v5335_v40  ;;  %v684_v40 = vld [vmem:[#allocation2 + $0x7b8] sm:$0xff] }
  0xf7   : > { %5338 = vmatprep.subr.bf16.mxu0 %v5337_v42  ;;  %v5375_v42 = vpack.c.bf16 %v679_v36, %v677_v35  ;;  %v5377_v43 = vpack.c.bf16 %v684_v40, %v682_v38 }
  0xfa   : > { %5340 = vmatpush1.bf16.msra.mxu0 %v5339_v47  ;;  %v688_v47 = vld [vmem:[#allocation2 + $0x7d8] sm:$0xff] }
  0xfb   : > { %5342 = vmatprep.subr.bf16.mxu0 %v5341_v23  ;;  %v5379_v23 = vpack.c.bf16 %v683_v45, %v681_v44  ;;  %v5381_v48 = vpack.c.bf16 %v688_v47, %v686_v46 }
  0xfe   : > { %5344 = vmatpush1.bf16.msra.mxu0 %v5343_v51  ;;  %v692_v51 = vld [vmem:[#allocation2 + $0x7f8] sm:$0xff] }
  0xff   : > { %5346 = vmatprep.subr.bf16.mxu0 %v5345_v52  ;;  %v5383_v52 = vpack.c.bf16 %v687_v49, %v685_v39  ;;  %v5385_v53 = vpack.c.bf16 %v692_v51, %v690_v50 }
 0x102   : > { %5348 = vmatpush1.bf16.msra.mxu0 %v5347_v59  ;;  %v5387_v59 = vpack.c.bf16 %v691_v56, %v689_v54 }
 0x103   : > { %5350 = vmatprep.subr.bf16.mxu0 %v5349_v60 }
 0x106   : > { %5352 = vmatpush1.bf16.msra.mxu0 %v5351_v1 }
 0x107   : > { %5354 = vmatprep.subr.bf16.mxu0 %v5353_v2  ;;  %v1328_v2 = vpop.permute.xlu0 %1327 }
 0x10a   : > { %5356 = vmatpush1.bf16.msra.mxu0 %v5355_v7 }
 0x10b   : > { %5358 = vmatprep.subr.bf16.mxu0 %v5357_v8 }
 0x10e   : > { %5360 = vmatpush1.bf16.msra.mxu0 %v5359_v13 }
 0x10f   : > { %5362 = vmatprep.subr.bf16.mxu0 %v5361_v14 }
 0x112   : > { %5364 = vmatpush1.bf16.msra.mxu0 %v5363_v19 }
 0x113   : > { %5366 = vmatprep.subr.bf16.mxu0 %v5365_v20 }
 0x116   : > { %5368 = vmatpush1.bf16.msra.mxu0 %v5367_v27  ;;  %v1588_v4 = vpop.permute.xlu0 %1587 }
 0x117   : > { %5370 = vmatprep.subr.bf16.mxu0 %v5369_v28 }
 0x11a   : > { %5372 = vmatpush1.bf16.msra.mxu0 %v5371_v33  ;;  %v1740_v6 = vpop.permute.xlu0 %1739 }
 0x11b   : > { %5374 = vmatprep.subr.bf16.mxu0 %v5373_v34 }
 0x11e   : > { %5376 = vmatpush1.bf16.msra.mxu0 %v5375_v42  ;;  %v1911_v8 = vpop.permute.xlu0 %1910 }
 0x11f   : > { %5378 = vmatprep.subr.bf16.mxu0 %v5377_v43 }
 0x122   : > { %5380 = vmatpush1.bf16.msra.mxu0 %v5379_v23  ;;  %v2063_v10 = vpop.permute.xlu0 %2062 }
 0x123   : > { %5382 = vmatprep.subr.bf16.mxu0 %v5381_v48 }
 0x126   : > { %5384 = vmatpush1.bf16.msra.mxu0 %v5383_v52  ;;  %v2234_v12 = vpop.permute.xlu0 %2233 }
 0x127   : > { %5386 = vmatprep.subr.bf16.mxu0 %v5385_v53 }
 0x12a   : > { %5388 = vmatpush1.bf16.msra.mxu0 %v5387_v59  ;;  %v2386_v14 = vpop.permute.xlu0 %2385 }
 0x12d   : > { %983 = vmatmul.mubr.f32.vlgmr.msra.gmra.mrb[0].mxu0 %v5873_v21  ;;  %v5909_v21 = vld [vmem:[%s6373_s8 + $0x8] sm:$0xff] }
 0x12e   : > { %3757 = vrot.lane.b32.xlu1 %v5909_v21, %s5590_s21  ;;  %3905 = vrot.lane.b32.xlu0 %v5909_v21, %s5592_s19  ;;  %v2557_v16 = vpop.permute.xlu0 %2556  ;;  %s5622_s21 = smov 15  }
 0x132   : > { %3982 = vrot.lane.b32.xlu1 %v5909_v21, %s5591_s22  ;;  %v2709_v18 = vpop.permute.xlu0 %2708  ;;  %s5623_s22 = smov 1  }
 0x136   : > { %v2863_v20 = vpop.permute.xlu0 %2862 }
 0x13a   : > { %v3015_v24 = vpop.permute.xlu0 %3014 }
 0x13e   : > { %v3186_v26 = vpop.permute.xlu0 %3185 }
 0x142   : > { %v3338_v28 = vpop.permute.xlu0 %3337 }
 0x146   : > { %v3509_v30 = vpop.permute.xlu0 %3508 }
 0x14a   : > { %v3661_v31 = vpop.permute.xlu0 %3660 }
 0x176   : > { %v5884_v60 = vpop.f32.mrb[0].mxu1 }
 0x177   : > { %v5886_v62 = vpop.f32.mrb[1].mxu1 }
 0x187   : > { %v5888_v41 = vpop.f32.mrb[2].mxu1 }
 0x188   : > { %v5890_v63 = vpop.f32.mrb[3].mxu1 }
 0x1a0   : > { %v3906_v35 = vpop.permute.xlu0 %3905 }
 0x200   : > { %v5917_v0 = vpop.f32.mrb[0].mxu0 }
 0x201   : > { %v5919_v1 = vpop.f32.mrb[1].mxu0 }
 0x202   : > { %5012 = vmatprep.subr.msk.mxu1 %vm1172_vm1, %v5919_v1 }
 0x203   : > { %5013 = vmatpush1.msk.msra.mxu1 %vm1172_vm1, %v5917_v0 }
 0x204   : > { %5014 = vmatmul.mubr.msk.f32.vlgmr.msra.gmra.mrb[4].mxu1 %vm1169_vm3, %v5830_v55  ;;  %5015 = vmatprep.subr.msk.mxu1 %vm1172_vm1, %v5886_v62  ;;  %v1411_v55 = vpop.permute.xlu1 %1410 }
 0x205   : > { %5016 = vmatpush1.msk.msra.mxu1 %vm1172_vm1, %v5884_v60  ;;  %1401 = vmatprep.mubr.f32.mxu1 %v5589_v58 }
 0x206   : > { %5018 = vmatprep.subr.msk.mxu1 %vm1172_vm1, %v5890_v63 }
 0x208   : > { %v1513_v3 = vpop.permute.xlu1 %1512 }
 0x20c   : > { %5017 = vmatmul.mubr.msk.f32.vlgmr.msra.gmra.mrb[4].mxu1 %vm1169_vm3, %v1328_v2  ;;  %v1663_v5 = vpop.permute.xlu1 %1662  ;;  %v429_v2 = vld [vmem:[%s6365_s0] sm:$0xff] }
 0x20d   : > { %5019 = vmatpush1.msk.msra.mxu1 %vm1172_vm1, %v5888_v41  ;;  %1484 = vmatprep.mubr.f32.mxu1 %v5589_v58 }
 0x20e   : > { %5021 = vmatprep.subr.msk.mxu1 %vm1172_vm1, %v5840_v61 }
 0x210   : > { %v1836_v7 = vpop.permute.xlu1 %1835 }
 0x214   : > { %5020 = vmatmul.mubr.msk.f32.vlgmr.msra.gmra.mrb[4].mxu1 %vm1169_vm3, %v1411_v55  ;;  %v1986_v9 = vpop.permute.xlu1 %1985 }
 0x215   : > { %5022 = vmatpush1.msk.msra.mxu1 %vm1172_vm1, %v5796_v37  ;;  %1580 = vmatprep.mubr.f32.mxu1 %v5589_v58 }
 0x216   : > { %5024 = vmatprep.subr.msk.mxu1 %vm1172_vm1, %v5919_v1 }
 0x218   : > { %5023 = vmatmul.mubr.msk.f32.vlgmr.msra.gmra.mrb[6].mxu1 %vm1169_vm3, %v1513_v3  ;;  %v2159_v11 = vpop.permute.xlu1 %2158  ;;  %v430_v3 = vld [vmem:[%s6365_s0 + $0x8] sm:$0xff] }
 0x219   : > { %5025 = vmatpush1.msk.msra.mxu1 %vm1172_vm1, %v5917_v0  ;;  %1655 = vmatprep.mubr.f32.mxu1 %v5589_v58 }
 0x21a   : > { %5027 = vmatprep.subr.msk.mxu1 %vm1172_vm1, %v5886_v62 }
 0x21c   : > { %v2309_v13 = vpop.permute.xlu1 %2308 }
 0x220   : > { %5026 = vmatmul.mubr.msk.f32.vlgmr.msra.gmra.mrb[6].mxu1 %vm1169_vm3, %v1588_v4  ;;  %v2482_v15 = vpop.permute.xlu1 %2481 }
 0x221   : > { %5028 = vmatpush1.msk.msra.mxu1 %vm1172_vm1, %v5884_v60  ;;  %1730 = vmatprep.mubr.f32.mxu1 %v5589_v58 }
 0x222   : > { %5030 = vmatprep.subr.msk.mxu1 %vm1172_vm1, %v5890_v63 }
 0x224   : > { %v2632_v17 = vpop.permute.xlu1 %2631 }
 0x228   : > { %5029 = vmatmul.mubr.msk.f32.vlgmr.msra.gmra.mrb[6].mxu1 %vm1169_vm3, %v1663_v5  ;;  %v2788_v19 = vpop.permute.xlu1 %2787 }
 0x229   : > { %5031 = vmatpush1.msk.msra.mxu1 %vm1172_vm1, %v5888_v41  ;;  %1807 = vmatprep.mubr.f32.mxu1 %v5589_v58 }
 0x22a   : > { %5033 = vmatprep.subr.msk.mxu1 %vm1172_vm1, %v5840_v61 }
 0x22c   : > { %v2938_v22 = vpop.permute.xlu1 %2937 }
 0x230   : > { %5032 = vmatmul.mubr.msk.f32.vlgmr.msra.gmra.mrb[6].mxu1 %vm1169_vm3, %v1740_v6  ;;  %v3111_v25 = vpop.permute.xlu1 %3110 }
 0x231   : > { %5034 = vmatpush1.msk.msra.mxu1 %vm1172_vm1, %v5796_v37  ;;  %1903 = vmatprep.mubr.f32.mxu1 %v5589_v58 }
 0x232   : > { %5036 = vmatprep.subr.msk.mxu1 %vm1172_vm1, %v5919_v1 }
 0x234   : > { %5035 = vmatmul.mubr.msk.f32.vlgmr.msra.gmra.mrb[8].mxu1 %vm1169_vm3, %v1836_v7  ;;  %v3261_v27 = vpop.permute.xlu1 %3260 }
 0x235   : > { %5037 = vmatpush1.msk.msra.mxu1 %vm1172_vm1, %v5917_v0  ;;  %1978 = vmatprep.mubr.f32.mxu1 %v5589_v58 }
 0x236   : > { %5039 = vmatprep.subr.msk.mxu1 %vm1172_vm1, %v5886_v62 }
 0x238   : > { %v3434_v29 = vpop.permute.xlu1 %3433 }
 0x23c   : > { %5038 = vmatmul.mubr.msk.f32.vlgmr.msra.gmra.mrb[8].mxu1 %vm1169_vm3, %v1911_v8 }
 0x23d   : > { %5040 = vmatpush1.msk.msra.mxu1 %vm1172_vm1, %v5884_v60  ;;  %2053 = vmatprep.mubr.f32.mxu1 %v5589_v58 }
 0x23e   : > { %5042 = vmatprep.subr.msk.mxu1 %vm1172_vm1, %v5890_v63 }
 0x244   : > { %5041 = vmatmul.mubr.msk.f32.vlgmr.msra.gmra.mrb[8].mxu1 %vm1169_vm3, %v1986_v9 }
 0x245   : > { %5043 = vmatpush1.msk.msra.mxu1 %vm1172_vm1, %v5888_v41  ;;  %2130 = vmatprep.mubr.f32.mxu1 %v5589_v58 }
 0x246   : > { %5045 = vmatprep.subr.msk.mxu1 %vm1172_vm1, %v5840_v61 }
 0x24c   : > { %5044 = vmatmul.mubr.msk.f32.vlgmr.msra.gmra.mrb[8].mxu1 %vm1169_vm3, %v2063_v10 }
 0x24d   : > { %5046 = vmatpush1.msk.msra.mxu1 %vm1172_vm1, %v5796_v37  ;;  %2226 = vmatprep.mubr.f32.mxu1 %v5589_v58 }
 0x24e   : > { %5048 = vmatprep.subr.msk.mxu1 %vm1172_vm1, %v5919_v1 }
 0x250   : > { %5047 = vmatmul.mubr.msk.f32.vlgmr.msra.gmra.mrb[10].mxu1 %vm1169_vm3, %v2159_v11 }
 0x251   : > { %5049 = vmatpush1.msk.msra.mxu1 %vm1172_vm1, %v5917_v0  ;;  %2301 = vmatprep.mubr.f32.mxu1 %v5589_v58 }
 0x252   : > { %5051 = vmatprep.subr.msk.mxu1 %vm1172_vm1, %v5886_v62 }
 0x258   : > { %5050 = vmatmul.mubr.msk.f32.vlgmr.msra.gmra.mrb[10].mxu1 %vm1169_vm3, %v2234_v12 }
 0x259   : > { %5052 = vmatpush1.msk.msra.mxu1 %vm1172_vm1, %v5884_v60  ;;  %2376 = vmatprep.mubr.f32.mxu1 %v5589_v58 }
 0x25a   : > { %5054 = vmatprep.subr.msk.mxu1 %vm1172_vm1, %v5890_v63 }
 0x260   : > { %5053 = vmatmul.mubr.msk.f32.vlgmr.msra.gmra.mrb[10].mxu1 %vm1169_vm3, %v2309_v13 }
 0x261   : > { %5055 = vmatpush1.msk.msra.mxu1 %vm1172_vm1, %v5888_v41  ;;  %2453 = vmatprep.mubr.f32.mxu1 %v5589_v58 }
 0x262   : > { %5057 = vmatprep.subr.msk.mxu1 %vm1172_vm1, %v5840_v61 }
 0x268   : > { %5056 = vmatmul.mubr.msk.f32.vlgmr.msra.gmra.mrb[10].mxu1 %vm1169_vm3, %v2386_v14 }
 0x269   : > { %5058 = vmatpush1.msk.msra.mxu1 %vm1172_vm1, %v5796_v37  ;;  %2549 = vmatprep.mubr.f32.mxu1 %v5589_v58 }
 0x26a   : > { %5060 = vmatprep.subr.msk.mxu1 %vm1172_vm1, %v5919_v1 }
 0x26c   : > { %5059 = vmatmul.mubr.msk.f32.vlgmr.msra.gmra.mrb[12].mxu1 %vm1169_vm3, %v2482_v15 }
 0x26d   : > { %5061 = vmatpush1.msk.msra.mxu1 %vm1172_vm1, %v5917_v0  ;;  %2624 = vmatprep.mubr.f32.mxu1 %v5589_v58 }
 0x26e   : > { %5063 = vmatprep.subr.msk.mxu1 %vm1172_vm1, %v5886_v62 }
 0x274   : > { %5062 = vmatmul.mubr.msk.f32.vlgmr.msra.gmra.mrb[12].mxu1 %vm1169_vm3, %v2557_v16 }
 0x275   : > { %5064 = vmatpush1.msk.msra.mxu1 %vm1172_vm1, %v5884_v60  ;;  %2699 = vmatprep.mubr.f32.mxu1 %v5589_v58 }
 0x276   : > { %5066 = vmatprep.subr.msk.mxu1 %vm1172_vm1, %v5890_v63 }
 0x27c   : > { %5065 = vmatmul.mubr.msk.f32.vlgmr.msra.gmra.mrb[12].mxu1 %vm1169_vm3, %v2632_v17 }
 0x27d   : > { %5067 = vmatpush1.msk.msra.mxu1 %vm1172_vm1, %v5888_v41  ;;  %2776 = vmatprep.mubr.f32.mxu1 %v5589_v58 }
 0x27e   : > { %5069 = vmatprep.subr.msk.mxu1 %vm1172_vm1, %v5840_v61 }
 0x284   : > { %5068 = vmatmul.mubr.msk.f32.vlgmr.msra.gmra.mrb[12].mxu1 %vm1169_vm3, %v2709_v18 }
 0x285   : > { %5070 = vmatpush1.msk.msra.mxu1 %vm1172_vm1, %v5796_v37  ;;  %2855 = vmatprep.mubr.f32.mxu1 %v5589_v58 }
 0x286   : > { %5072 = vmatprep.subr.msk.mxu1 %vm1172_vm1, %v5919_v1 }
 0x288   : > { %5071 = vmatmul.mubr.msk.f32.vlgmr.msra.gmra.mrb[14].mxu1 %vm1169_vm3, %v2788_v19 }
 0x289   : > { %5073 = vmatpush1.msk.msra.mxu1 %vm1172_vm1, %v5917_v0  ;;  %2930 = vmatprep.mubr.f32.mxu1 %v5589_v58 }
 0x28a   : > { %5075 = vmatprep.subr.msk.mxu1 %vm1172_vm1, %v5886_v62 }
 0x290   : > { %5074 = vmatmul.mubr.msk.f32.vlgmr.msra.gmra.mrb[14].mxu1 %vm1169_vm3, %v2863_v20 }
 0x291   : > { %5076 = vmatpush1.msk.msra.mxu1 %vm1172_vm1, %v5884_v60  ;;  %3005 = vmatprep.mubr.f32.mxu1 %v5589_v58 }
 0x292   : > { %5078 = vmatprep.subr.msk.mxu1 %vm1172_vm1, %v5890_v63 }
 0x298   : > { %5077 = vmatmul.mubr.msk.f32.vlgmr.msra.gmra.mrb[14].mxu1 %vm1169_vm3, %v2938_v22 }
 0x299   : > { %5079 = vmatpush1.msk.msra.mxu1 %vm1172_vm1, %v5888_v41  ;;  %3082 = vmatprep.mubr.f32.mxu1 %v5589_v58 }
 0x29a   : > { %5081 = vmatprep.subr.msk.mxu1 %vm1172_vm1, %v5840_v61 }
 0x2a0   : > { %5080 = vmatmul.mubr.msk.f32.vlgmr.msra.gmra.mrb[14].mxu1 %vm1169_vm3, %v3015_v24 }
 0x2a1   : > { %5082 = vmatpush1.msk.msra.mxu1 %vm1172_vm1, %v5796_v37  ;;  %3178 = vmatprep.mubr.f32.mxu1 %v5589_v58 }
 0x2a2   : > { %5084 = vmatprep.subr.msk.mxu1 %vm1172_vm1, %v5919_v1 }
 0x2a4   : > { %5083 = vmatmul.mubr.msk.f32.vlgmr.msra.gmra.mrb[16].mxu1 %vm1169_vm3, %v3111_v25 }
 0x2a5   : > { %5085 = vmatpush1.msk.msra.mxu1 %vm1172_vm1, %v5917_v0  ;;  %3253 = vmatprep.mubr.f32.mxu1 %v5589_v58 }
 0x2a6   : > { %5087 = vmatprep.subr.msk.mxu1 %vm1172_vm1, %v5886_v62 }
 0x2ac   : > { %5086 = vmatmul.mubr.msk.f32.vlgmr.msra.gmra.mrb[16].mxu1 %vm1169_vm3, %v3186_v26 }
 0x2ad   : > { %5088 = vmatpush1.msk.msra.mxu1 %vm1172_vm1, %v5884_v60  ;;  %3328 = vmatprep.mubr.f32.mxu1 %v5589_v58 }
 0x2ae   : > { %5090 = vmatprep.subr.msk.mxu1 %vm1172_vm1, %v5890_v63 }
 0x2b4   : > { %5089 = vmatmul.mubr.msk.f32.vlgmr.msra.gmra.mrb[16].mxu1 %vm1169_vm3, %v3261_v27 }
 0x2b5   : > { %5091 = vmatpush1.msk.msra.mxu1 %vm1172_vm1, %v5888_v41  ;;  %3405 = vmatprep.mubr.f32.mxu1 %v5589_v58 }
 0x2b6   : > { %5093 = vmatprep.subr.msk.mxu1 %vm1172_vm1, %v5840_v61 }
 0x2bc   : > { %5092 = vmatmul.mubr.msk.f32.vlgmr.msra.gmra.mrb[16].mxu1 %vm1169_vm3, %v3338_v28 }
 0x2bd   : > { %5094 = vmatpush1.msk.msra.mxu1 %vm1172_vm1, %v5796_v37  ;;  %3501 = vmatprep.mubr.f32.mxu1 %v5589_v58  ;;  %v3584_v37 = vpop.permute.xlu1 %3583 }
 0x2be   : > { %5096 = vmatprep.subr.msk.mxu1 %vm1172_vm1, %v5919_v1 }
 0x2c0   : > { %5095 = vmatmul.mubr.msk.f32.vlgmr.msra.gmra.mrb[18].mxu1 %vm1169_vm3, %v3434_v29 }
 0x2c1   : > { %5097 = vmatpush1.msk.msra.mxu1 %vm1172_vm1, %v5917_v0  ;;  %3576 = vmatprep.mubr.f32.mxu1 %v5589_v58  ;;  %v3758_v33 = vpop.permute.xlu1 %3757 }
 0x2c2   : > { %5099 = vmatprep.subr.msk.mxu1 %vm1172_vm1, %v5886_v62 }
 0x2c5   : > { %v3983_v36 = vpop.permute.xlu1 %3982 }
 0x2c8   : > { %5098 = vmatmul.mubr.msk.f32.vlgmr.msra.gmra.mrb[18].mxu1 %vm1169_vm3, %v3509_v30 }
 0x2c9   : > { %5100 = vmatpush1.msk.msra.mxu1 %vm1172_vm1, %v5884_v60  ;;  %3651 = vmatprep.mubr.f32.mxu1 %v5589_v58 }
 0x2ca   : > { %5102 = vmatprep.subr.msk.mxu1 %vm1172_vm1, %v5890_v63 }
 0x2d0   : > { %5101 = vmatmul.mubr.msk.f32.vlgmr.msra.gmra.mrb[18].mxu1 %vm1169_vm3, %v3584_v37 }
 0x2d1   : > { %5103 = vmatpush1.msk.msra.mxu1 %vm1172_vm1, %v5888_v41  ;;  %3728 = vmatprep.mubr.f32.mxu1 %v5589_v58 }
 0x2d2   : > { %5105 = vmatprep.subr.msk.mxu1 %vm1172_vm1, %v5840_v61 }
 0x2d8   : > { %5104 = vmatmul.mubr.msk.f32.vlgmr.msra.gmra.mrb[18].mxu1 %vm1169_vm3, %v3661_v31 }
 0x2d9   : > { %5106 = vmatpush1.msk.msra.mxu1 %vm1172_vm1, %v5545_v32  ;;  %3825 = vmatprep.mubr.f32.mxu1 %v5589_v58 }
 0x2da   : > { %5108 = vmatprep.subr.msk.mxu1 %vm1172_vm1, %v5919_v1 }
 0x2dc   : > { %5107 = vmatmul.mubr.msk.f32.vlgmr.msra.gmra.mrb[20].mxu1 %vm1169_vm3, %v3758_v33 }
 0x2dd   : > { %5109 = vmatpush1.msk.msra.mxu1 %vm1172_vm1, %v5917_v0  ;;  %3898 = vmatprep.mubr.f32.mxu1 %v5589_v58 }
 0x2de   : > { %5111 = vmatprep.subr.msk.mxu1 %vm1172_vm1, %v5886_v62  ;;  %v6153_v62 = vshrl.u32 %v1497_v57, 7 }
 0x2e0   : > { %v1504_v1 = vsub.s32 0, %v6153_v62  ;;  %v2148_v55 = vsub.s32 2, %v6153_v62  ;;  %v2471_v7 = vsub.s32 3, %v6153_v62  ;;  %v3100_v29 = vsub.s32 5, %v6153_v62 }
 0x2e1   : > { %v3423_v33 = vsub.s32 6, %v6153_v62 }
 0x2e2   : > { %v6174_v9 = vrot.slane %v429_v2, %v1504_v1  ;;  %v6180_v12 = vrot.slane %v430_v3, %v1504_v1  ;;  %v6182_v13 = vrot.slane %v429_v2, %v2148_v55  ;;  %v6184_v14 = vrot.slane %v430_v3, %v2148_v55 }
 0x2e3   : > { %v6197_v22 = vrot.slane %v429_v2, %v2471_v7  ;;  %v6199_v24 = vrot.slane %v430_v3, %v2471_v7 }
 0x2e4   : > { %5110 = vmatmul.mubr.msk.f32.vlgmr.msra.gmra.mrb[20].mxu1 %vm1169_vm3, %v5909_v21 }
 0x2e5   : > { %5112 = vmatpush1.msk.msra.mxu1 %vm1172_vm1, %v5884_v60  ;;  %3973 = vmatprep.mubr.f32.mxu1 %v5589_v58 }
 0x2e6   : > { %5114 = vmatprep.subr.msk.mxu1 %vm1172_vm1, %v5890_v63  ;;  %v1825_v63 = vsub.s32 1, %v6153_v62 }
 0x2e7   : > { %v1486_v61 = vpop.f32.mrb[4].mxu1 }
 0x2e8   : > { %1493 = vrot.lane.b32.xlu0 %v1486_v61, %s5621_s23  ;;  %v1488_v34 = vpop.f32.mrb[5].mxu1  ;;  %v6168_v4 = vrot.slane %v429_v2, %v1825_v63  ;;  %v6170_v5 = vrot.slane %v430_v3, %v1825_v63 }
 0x2e9   : > { %1495 = vrot.lane.b32.xlu1 %v1488_v34, %s5621_s23 }
 0x2ec   : > { %5113 = vmatmul.mubr.msk.f32.vlgmr.msra.gmra.mrb[20].mxu1 %vm1169_vm3, %v3906_v35 }
 0x2ed   : > { %5115 = vmatpush1.msk.msra.mxu1 %vm1172_vm1, %v5888_v41  ;;  %4050 = vmatprep.mubr.f32.mxu1 %v5589_v58  ;;  %v6155_v41 = vand.u32 127, %v1497_v57 }
 0x2ef   : > { %vm1820_vm4 = vcmp.lt.s32.totalorder %v6155_v41, 16  ;;  %vm1499_vm5 = vcmp.lt.s32.totalorder %v6155_v41, 17  ;;  %vm2143_vm6 = vcmp.lt.s32.totalorder %v6155_v41, 15  ;;  %vm2466_vm7 = vcmp.lt.s32.totalorder %v6155_v41, 1 }
 0x2f0   : > { %vm3095_vm8 = vcmp.lt.s32.totalorder %v6155_v41, 127  ;;  %vm3418_vm9 = vcmp.lt.s32.totalorder %v6155_v41, 113  ;;  %vm3741_vm10 = vcmp.lt.s32.totalorder %v6155_v41, 112  ;;  %vm4063_vm11 = vcmp.lt.s32.totalorder %v6155_v41, 111 }
 0x2f4   : > { %5116 = vmatmul.mubr.msk.f32.vlgmr.msra.gmra.mrb[20].mxu1 %vm1169_vm3, %v3983_v36 }
 0x2f5   : > { %4174 = vmatprep.mubr.f32.mxu1 %v5589_v58 }
 0x303   : > { %v1809_v38 = vpop.f32.mrb[6].mxu1 }
 0x304   : > { %1816 = vrot.lane.b32.xlu0 %v1809_v38, %s5618_s11  ;;  %v1811_v40 = vpop.f32.mrb[7].mxu1 }
 0x305   : > { %1818 = vrot.lane.b32.xlu1 %v1811_v40, %s5618_s11 }
 0x31f   : > { %v2132_v42 = vpop.f32.mrb[8].mxu1 }
 0x320   : > { %2139 = vrot.lane.b32.xlu0 %v2132_v42, %s5622_s21  ;;  %v2134_v43 = vpop.f32.mrb[9].mxu1  ;;  %v6214_v42 = vrot.slane %v429_v2, %v3100_v29 }
 0x321   : > { %2141 = vrot.lane.b32.xlu1 %v2134_v43, %s5622_s21  ;;  %v6216_v43 = vrot.slane %v430_v3, %v3100_v29 }
 0x33b   : > { %v2455_v44 = vpop.f32.mrb[10].mxu1 }
 0x33c   : > { %2462 = vrot.lane.b32.xlu0 %v2455_v44, %s5623_s22  ;;  %v2457_v45 = vpop.f32.mrb[11].mxu1 }
 0x33d   : > { %2464 = vrot.lane.b32.xlu1 %v2457_v45, %s5623_s22 }
 0x357   : > { %v6141_v46 = vpop.f32.mrb[12].mxu1 }
 0x358   : > { %v6143_v47 = vpop.f32.mrb[13].mxu1 }
 0x35a   : > { %v1494_v54 = vpop.permute.xlu0 %1493 }
 0x35b   : > { %v1496_v56 = vpop.permute.xlu1 %1495 }
 0x35c   : > { %v1500_v15 = vsel %vm1499_vm5, %v1494_v54, %v1496_v56  ;;  %v1501_v16 = vsel %vm1499_vm5, %v1496_v56, %v1494_v54 }
 0x35d   : > { %v1510_v30 = vmul.f32 %v6174_v9, %v1501_v16  ;;  %v1511_v37 = vmul.f32 %v6180_v12, %v1500_v15  ;;  %v6253_v15 = vld [vmem:[%s6365_s0 + $0x10] ss:$0 sm:$0xff] }
 0x373   : > { %v3084_v23 = vpop.f32.mrb[14].mxu1 }
 0x374   : > { %3091 = vrot.lane.b32.xlu0 %v3084_v23, %s5624_s16  ;;  %v3086_v48 = vpop.f32.mrb[15].mxu1  ;;  %v3746_v23 = vsub.s32 7, %v6153_v62 }
 0x375   : > { %3093 = vrot.lane.b32.xlu1 %v3086_v48, %s5624_s16 }
 0x376   : > { %v1817_v59 = vpop.permute.xlu0 %1816  ;;  %v6235_v62 = vrot.slane %v429_v2, %v3746_v23  ;;  %v6237_v63 = vrot.slane %v430_v3, %v3746_v23 }
 0x377   : > { %v1819_v60 = vpop.permute.xlu1 %1818 }
 0x378   : > { %v1821_v10 = vsel %vm1820_vm4, %v1817_v59, %v1819_v60  ;;  %v1822_v11 = vsel %vm1820_vm4, %v1819_v60, %v1817_v59 }
 0x379   : > { %v1831_v19 = vmul.f32 %v6168_v4, %v1822_v11  ;;  %v1832_v20 = vmul.f32 %v6170_v5, %v1821_v10 }
 0x37b   : > { %v1833_v61 = vadd.f32 %v1831_v19, %v1510_v30  ;;  %v1834_v34 = vadd.f32 %v1832_v20, %v1511_v37  ;;  %v4105_v37 = vld [vmem:[%s6374_s9] sm:$0xff] }
 0x38f   : > { %v3407_v39 = vpop.f32.mrb[16].mxu1 }
 0x390   : > { %3414 = vrot.lane.b32.xlu0 %v3407_v39, %s5625_s27  ;;  %v3409_v49 = vpop.f32.mrb[17].mxu1 }
 0x391   : > { %3416 = vrot.lane.b32.xlu1 %v3409_v49, %s5625_s27  ;;  %v6224_v49 = vrot.slane %v429_v2, %v3423_v33 }
 0x392   : > { %v2140_v21 = vpop.permute.xlu0 %2139 }
 0x393   : > { %v2142_v0 = vpop.permute.xlu1 %2141 }
 0x394   : > { %v2144_v17 = vsel %vm2143_vm6, %v2140_v21, %v2142_v0  ;;  %v2145_v18 = vsel %vm2143_vm6, %v2142_v0, %v2140_v21 }
 0x395   : > { %v2154_v31 = vmul.f32 %v6182_v13, %v2145_v18  ;;  %v2155_v32 = vmul.f32 %v6184_v14, %v2144_v17 }
 0x397   : > { %v2156_v44 = vadd.f32 %v2154_v31, %v1833_v61  ;;  %v2157_v45 = vadd.f32 %v2155_v32, %v1834_v34 }
 0x3ab   : > { %v3730_v50 = vpop.f32.mrb[18].mxu1 }
 0x3ac   : > { %3737 = vrot.lane.b32.xlu0 %v3730_v50, %s5594_s25  ;;  %v3732_v51 = vpop.f32.mrb[19].mxu1 }
 0x3ad   : > { %3739 = vrot.lane.b32.xlu1 %v3732_v51, %s5594_s25 }
 0x3ae   : > { %v2463_v6 = vpop.permute.xlu0 %2462 }
 0x3af   : > { %v2465_v8 = vpop.permute.xlu1 %2464 }
 0x3b0   : > { %v2467_v27 = vsel %vm2466_vm7, %v2463_v6, %v2465_v8  ;;  %v2468_v28 = vsel %vm2466_vm7, %v2465_v8, %v2463_v6 }
 0x3b1   : > { %v2477_v35 = vmul.f32 %v6197_v22, %v2468_v28  ;;  %v2478_v36 = vmul.f32 %v6199_v24, %v2467_v27 }
 0x3b3   : > { %v2479_v50 = vadd.f32 %v2477_v35, %v2156_v44  ;;  %v2480_v51 = vadd.f32 %v2478_v36, %v2157_v45 }
 0x3b5   : > { %v2785_v1 = vadd.f32 %v6141_v46, %v2479_v50  ;;  %v2786_v55 = vadd.f32 %v6143_v47, %v2480_v51  ;;  %v6258_v46 = vld [vmem:[%s6365_s0 + $0x18] ss:$0 sm:$0xff] }
 0x3c7   : > { %v4052_v52 = vpop.f32.mrb[20].mxu1 }
 0x3c8   : > { %4059 = vrot.lane.b32.xlu0 %v4052_v52, %s5626_s28  ;;  %v4054_v53 = vpop.f32.mrb[21].mxu1  ;;  %v6226_v52 = vrot.slane %v430_v3, %v3423_v33 }
 0x3c9   : > { %4061 = vrot.lane.b32.xlu1 %v4054_v53, %s5626_s28 }
 0x3e6   : > { %v3092_v25 = vpop.permute.xlu0 %3091 }
 0x3e7   : > { %v3094_v26 = vpop.permute.xlu1 %3093 }
 0x3e8   : > { %v3096_v48 = vsel %vm3095_vm8, %v3092_v25, %v3094_v26  ;;  %v3097_v39 = vsel %vm3095_vm8, %v3094_v26, %v3092_v25 }
 0x3e9   : > { %v3106_v59 = vmul.f32 %v6214_v42, %v3096_v48  ;;  %v3107_v60 = vmul.f32 %v6216_v43, %v3097_v39 }
 0x3eb   : > { %v3108_v2 = vadd.f32 %v3106_v59, %v2785_v1  ;;  %v3109_v8 = vadd.f32 %v3107_v60, %v2786_v55 }
 0x402   : > { %v3415_v38 = vpop.permute.xlu0 %3414 }
 0x403   : > { %v3417_v40 = vpop.permute.xlu1 %3416 }
 0x404   : > { %v3419_v56 = vsel %vm3418_vm9, %v3415_v38, %v3417_v40  ;;  %v3420_v57 = vsel %vm3418_vm9, %v3417_v40, %v3415_v38 }
 0x405   : > { %v3429_v6 = vmul.f32 %v6224_v49, %v3419_v56  ;;  %v3430_v7 = vmul.f32 %v6226_v52, %v3420_v57 }
 0x407   : > { %v3431_v47 = vadd.f32 %v3429_v6, %v3108_v2  ;;  %v3432_v16 = vadd.f32 %v3430_v7, %v3109_v8 }
 0x41e   : > { %v3738_v53 = vpop.permute.xlu0 %3737 }
 0x41f   : > { %v3740_v54 = vpop.permute.xlu1 %3739 }
 0x420   : > { %v3742_v21 = vsel %vm3741_vm10, %v3738_v53, %v3740_v54  ;;  %v3743_v0 = vsel %vm3741_vm10, %v3740_v54, %v3738_v53 }
 0x421   : > { %v3752_v3 = vmul.f32 %v6235_v62, %v3742_v21  ;;  %v3753_v10 = vmul.f32 %v6237_v63, %v3743_v0 }
 0x423   : > { %v3754_v20 = vadd.f32 %v3752_v3, %v3431_v47  ;;  %v3755_v25 = vadd.f32 %v3753_v10, %v3432_v16 }
 0x43a   : > { %v4060_v11 = vpop.permute.xlu0 %4059 }
 0x43b   : > { %v4062_v17 = vpop.permute.xlu1 %4061 }
 0x43c   : > { %v4064_v18 = vsel %vm4063_vm11, %v4060_v11, %v4062_v17  ;;  %v4065_v19 = vsel %vm4063_vm11, %v4062_v17, %v4060_v11 }
 0x43d   : > { %v4074_v26 = vmul.f32 %v6253_v15, %v4064_v18  ;;  %v4075_v27 = vmul.f32 %v6258_v46, %v4065_v19 }
 0x43f   : > { %v4076_v28 = vadd.f32 %v4074_v26, %v3754_v20  ;;  %v4077_v29 = vadd.f32 %v4075_v27, %v3755_v25 }
 0x441   : > { %v4078_v30 = vadd.f32 %v4077_v29, %v4076_v28 }
 0x443   : > { %4079 = vadd.xlane.f32.xlu0 %v4078_v30 }
 0x459   : > { %4189 = vrot.lane.b32.xlu0 %v4105_v37, %s5592_s19  ;;  %s6384_s19 = smov 64  }
 0x45d   : > { %4359 = vrot.lane.b32.xlu0 %v4105_v37, %s5595_s26 }
 0x461   : > { %4521 = vrot.lane.b32.xlu0 %v4105_v37, %s5599_s30 }
 0x465   : > { %4691 = vrot.lane.b32.xlu0 %v4105_v37, %s5603_s17 }
 0x4d0   : > { %v4080_v31 = vpop.xlane.xlu0 %4079 }
 0x4d1   : > { %v4082_v32 = vmul.f32 0.00390625, %v4080_v31 }
 0x4d3   : > { %v4083_v33 = vsub.f32 %v4076_v28, %v4082_v32  ;;  %v4084_v61 = vsub.f32 %v4077_v29, %v4082_v32 }
 0x4d4   : > { %v4190_v0 = vpop.permute.xlu0 %4189 }
 0x4d5   : > { %v4085_v34 = vmul.f32 %v4083_v33, %v4083_v33  ;;  %v4086_v35 = vmul.f32 %v4084_v61, %v4084_v61 }
 0x4d7   : > { %v4087_v36 = vadd.f32 %v4086_v35, %v4085_v34 }
 0x4d8   : > { %v4360_v55 = vpop.permute.xlu0 %4359 }
 0x4d9   : > { %4088 = vadd.xlane.f32.xlu1 %v4087_v36 }
 0x4dc   : > { %v4522_v7 = vpop.permute.xlu0 %4521 }
 0x4e0   : > { %v4692_v8 = vpop.permute.xlu0 %4691 }
 0x4ea   : > { %4274 = vrot.lane.b32.xlu1 %v4105_v37, %s5594_s25 }
 0x4ee   : > { %4444 = vrot.lane.b32.xlu1 %v4105_v37, %s5598_s29 }
 0x4f2   : > { %4606 = vrot.lane.b32.xlu1 %v4105_v37, %s5602_s15 }
 0x4f6   : > { %4776 = vrot.lane.b32.xlu1 %v4105_v37, %s6384_s19 }
 0x566   : > { %v4089_v38 = vpop.xlane.xlu1 %4088 }
 0x567   : > { %v4090_v40 = vmul.f32 0.00390625, %v4089_v38 }
 0x569   : > { %v4091_v44 = vadd.f32 1e-05, %v4090_v40 }
 0x56a   : > { %v4275_v1 = vpop.permute.xlu1 %4274 }
 0x56b   : > { %5533 = vrsqrt.f32 %v4091_v44 }
 0x56e   : > { %v4445_v6 = vpop.permute.xlu1 %4444 }
 0x572   : > { %v4607_v2 = vpop.permute.xlu1 %4606 }
 0x575   : > { %v5534_v45 = vpop.eup %5533 }
 0x576   : > { %v4093_v23 = vmul.f32 %v5534_v45, %v4083_v33  ;;  %v4094_v48 = vmul.f32 %v5534_v45, %v4084_v61  ;;  %v4777_v3 = vpop.permute.xlu1 %4776 }
 0x578   : > { %v4097_v39 = vmul.f32 0.70710677, %v4093_v23  ;;  %v4098_v50 = vmul.f32 0.70710677, %v4094_v48  ;;  %v4095_v54 = vmul.f32 0.5, %v4093_v23  ;;  %v4096_v57 = vmul.f32 0.5, %v4094_v48 }
 0x57a   : > { %5535 = verf.f32 %v4097_v39 }
 0x57b   : > { %5537 = verf.f32 %v4098_v50 }
 0x584   : > { %v5536_v51 = vpop.eup %5535 }
 0x585   : > { %v5538_v53 = vpop.eup %5537  ;;  %v4101_v56 = vadd.f32 1.0, %v5536_v51 }
 0x586   : > { %v4102_v59 = vadd.f32 1.0, %v5538_v53 }
 0x587   : > { %v4103_v60 = vmul.f32 %v4101_v56, %v4095_v54 }
 0x588   : > { %v4104_v21 = vmul.f32 %v4102_v59, %v4096_v57 }
 0x58a   : > { %4110 = vmatprep.subr.mxu1 %v4104_v21 }
 0x58b   : > { %4111 = vmatpush1.msra.mxu1 %v4103_v60 }
 0x58c   : > { %5119 = vmatmul.mubr.msk.f32.vlgmr.msra.gmra.mrb[22].mxu1 %vm4106_vm12, %v4105_v37  ;;  %4193 = vmatprep.subr.mxu1 %v4104_v21 }
 0x58d   : > { %4194 = vmatpush1.msra.mxu1 %v4103_v60  ;;  %4257 = vmatprep.mubr.f32.mxu1 %v5589_v58 }
 0x58e   : > { %4278 = vmatprep.subr.mxu1 %v4104_v21 }
 0x590   : > { %5120 = vmatmul.mubr.msk.f32.vlgmr.msra.gmra.mrb[24].mxu1 %vm4106_vm12, %v4190_v0 }
 0x591   : > { %4279 = vmatpush1.msra.mxu1 %v4103_v60  ;;  %4342 = vmatprep.mubr.f32.mxu1 %v5589_v58 }
 0x592   : > { %4363 = vmatprep.subr.mxu1 %v4104_v21 }
 0x594   : > { %5121 = vmatmul.mubr.msk.f32.vlgmr.msra.gmra.mrb[26].mxu1 %vm4106_vm12, %v4275_v1 }
 0x595   : > { %4364 = vmatpush1.msra.mxu1 %v4103_v60  ;;  %4427 = vmatprep.mubr.f32.mxu1 %v5589_v58 }
 0x596   : > { %4448 = vmatprep.subr.mxu1 %v4104_v21 }
 0x598   : > { %5122 = vmatmul.mubr.msk.f32.vlgmr.msra.gmra.mrb[28].mxu1 %vm4106_vm12, %v4360_v55 }
 0x599   : > { %4449 = vmatpush1.msra.mxu1 %v4103_v60  ;;  %4512 = vmatprep.mubr.f32.mxu1 %v5589_v58 }
 0x59a   : > { %4525 = vmatprep.subr.mxu1 %v4104_v21 }
 0x59c   : > { %5123 = vmatmul.mubr.msk.f32.vlgmr.msra.gmra.mrb[30].mxu1 %vm4106_vm12, %v4445_v6 }
 0x59d   : > { %4526 = vmatpush1.msra.mxu1 %v4103_v60  ;;  %4589 = vmatprep.mubr.f32.mxu1 %v5589_v58 }
 0x59e   : > { %4610 = vmatprep.subr.mxu1 %v4104_v21 }
 0x5a0   : > { %5124 = vmatmul.mubr.msk.f32.vlgmr.msra.gmra.mrb[32].mxu1 %vm4106_vm12, %v4522_v7 }
 0x5a1   : > { %4611 = vmatpush1.msra.mxu1 %v4103_v60  ;;  %4674 = vmatprep.mubr.f32.mxu1 %v5589_v58 }
 0x5a2   : > { %4695 = vmatprep.subr.mxu1 %v4104_v21 }
 0x5a4   : > { %5125 = vmatmul.mubr.msk.f32.vlgmr.msra.gmra.mrb[34].mxu1 %vm4106_vm12, %v4607_v2 }
 0x5a5   : > { %4696 = vmatpush1.msra.mxu1 %v4103_v60  ;;  %4759 = vmatprep.mubr.f32.mxu1 %v5589_v58 }
 0x5a6   : > { %4780 = vmatprep.subr.mxu1 %v4104_v21 }
 0x5a8   : > { %5126 = vmatmul.mubr.msk.f32.vlgmr.msra.gmra.mrb[36].mxu1 %vm4106_vm12, %v4692_v8 }
 0x5a9   : > { %4781 = vmatpush1.msra.mxu1 %v4103_v60  ;;  %4844 = vmatprep.mubr.f32.mxu1 %v5589_v58 }
 0x5ac   : > { %5127 = vmatmul.mubr.msk.f32.vlgmr.msra.gmra.mrb[38].mxu1 %vm4106_vm12, %v4777_v3 }
 0x65f   : > { %v4176_v10 = vpop.f32.mrb[22].mxu1 }
 0x660   : > { %v4178_v11 = vpop.f32.mrb[23].mxu1  ;;  %4181 = vrot.lane.b32.xlu0 %v4176_v10, %s5621_s23 }
 0x661   : > { %4183 = vrot.lane.b32.xlu1 %v4178_v11, %s5621_s23 }
 0x663   : > { %v4259_v47 = vpop.f32.mrb[24].mxu1 }
 0x664   : > { %v4261_v16 = vpop.f32.mrb[25].mxu1  ;;  %4264 = vrot.lane.b32.xlu0 %v4259_v47, %s5618_s11 }
 0x665   : > { %4266 = vrot.lane.b32.xlu1 %v4261_v16, %s5618_s11 }
 0x667   : > { %v4344_v17 = vpop.f32.mrb[26].mxu1 }
 0x668   : > { %v4346_v18 = vpop.f32.mrb[27].mxu1  ;;  %4349 = vrot.lane.b32.xlu0 %v4344_v17, %s5622_s21 }
 0x669   : > { %4351 = vrot.lane.b32.xlu1 %v4346_v18, %s5622_s21 }
 0x66b   : > { %v4429_v58 = vpop.f32.mrb[28].mxu1 }
 0x66c   : > { %v4431_v19 = vpop.f32.mrb[29].mxu1  ;;  %4434 = vrot.lane.b32.xlu0 %v4429_v58, %s5623_s22 }
 0x66d   : > { %4436 = vrot.lane.b32.xlu1 %v4431_v19, %s5623_s22 }
 0x66f   : > { %v4514_v20 = vpop.f32.mrb[30].mxu1 }
 0x670   : > { %v4516_v25 = vpop.f32.mrb[31].mxu1 }
 0x673   : > { %v4591_v26 = vpop.f32.mrb[32].mxu1 }
 0x674   : > { %v4593_v27 = vpop.f32.mrb[33].mxu1  ;;  %4596 = vrot.lane.b32.xlu0 %v4591_v26, %s5624_s16 }
 0x675   : > { %4598 = vrot.lane.b32.xlu1 %v4593_v27, %s5624_s16 }
 0x677   : > { %v4676_v28 = vpop.f32.mrb[34].mxu1 }
 0x678   : > { %v4678_v29 = vpop.f32.mrb[35].mxu1  ;;  %4681 = vrot.lane.b32.xlu0 %v4676_v28, %s5625_s27 }
 0x679   : > { %4683 = vrot.lane.b32.xlu1 %v4678_v29, %s5625_s27 }
 0x67b   : > { %v4761_v30 = vpop.f32.mrb[36].mxu1 }
 0x67c   : > { %v4763_v37 = vpop.f32.mrb[37].mxu1  ;;  %4766 = vrot.lane.b32.xlu0 %v4761_v30, %s5594_s25 }
 0x67d   : > { %4768 = vrot.lane.b32.xlu1 %v4763_v37, %s5594_s25  ;;  %s5132_s25 = sshll.u32 %s6386_s14, 4 }
 0x67e   : > { %s428_s30 = scalar_lea.vmem %s6375_s10, %s5132_s25 }
 0x67f   : > { %v4846_v31 = vpop.f32.mrb[38].mxu1 }
 0x680   : > { %v4848_v32 = vpop.f32.mrb[39].mxu1  ;;  %4851 = vrot.lane.b32.xlu0 %v4846_v31, %s5626_s28 }
 0x681   : > { %4853 = vrot.lane.b32.xlu1 %v4848_v32, %s5626_s28 }
 0x6d2   : > { %v4182_v33 = vpop.permute.xlu0 %4181 }
 0x6d3   : > { %v4184_v61 = vpop.permute.xlu1 %4183 }
 0x6d4   : > { %v4185_v48 = vsel %vm1499_vm5, %v4182_v33, %v4184_v61  ;;  %v4186_v39 = vsel %vm1499_vm5, %v4184_v61, %v4182_v33 }
 0x6d5   : > { %v4187_v59 = vmul.f32 %v4186_v39, %v6174_v9  ;;  %v4188_v60 = vmul.f32 %v4185_v48, %v6180_v12 }
 0x6d6   : > { %v4265_v34 = vpop.permute.xlu0 %4264 }
 0x6d7   : > { %v4267_v35 = vpop.permute.xlu1 %4266 }
 0x6d8   : > { %v4268_v40 = vsel %vm1820_vm4, %v4265_v34, %v4267_v35  ;;  %v4269_v44 = vsel %vm1820_vm4, %v4267_v35, %v4265_v34 }
 0x6d9   : > { %v4270_v53 = vmul.f32 %v4269_v44, %v6168_v4  ;;  %v4271_v54 = vmul.f32 %v4268_v40, %v6170_v5 }
 0x6da   : > { %v4350_v38 = vpop.permute.xlu0 %4349 }
 0x6db   : > { %v4352_v36 = vpop.permute.xlu1 %4351  ;;  %v4272_v55 = vadd.f32 %v4270_v53, %v4187_v59  ;;  %v4273_v6 = vadd.f32 %v4271_v54, %v4188_v60 }
 0x6dc   : > { %v4353_v50 = vsel %vm2143_vm6, %v4350_v38, %v4352_v36  ;;  %v4354_v51 = vsel %vm2143_vm6, %v4352_v36, %v4350_v38 }
 0x6dd   : > { %v4355_v21 = vmul.f32 %v4354_v51, %v6182_v13  ;;  %v4356_v0 = vmul.f32 %v4353_v50, %v6184_v14 }
 0x6de   : > { %v4435_v23 = vpop.permute.xlu0 %4434 }
 0x6df   : > { %v4437_v45 = vpop.permute.xlu1 %4436  ;;  %v4357_v2 = vadd.f32 %v4355_v21, %v4272_v55  ;;  %v4358_v8 = vadd.f32 %v4356_v0, %v4273_v6 }
 0x6e0   : > { %v4438_v56 = vsel %vm2466_vm7, %v4435_v23, %v4437_v45  ;;  %v4439_v57 = vsel %vm2466_vm7, %v4437_v45, %v4435_v23 }
 0x6e1   : > { %v4440_v4 = vmul.f32 %v4439_v57, %v6197_v22  ;;  %v4441_v5 = vmul.f32 %v4438_v56, %v6199_v24 }
 0x6e3   : > { %v4442_v13 = vadd.f32 %v4440_v4, %v4357_v2  ;;  %v4443_v10 = vadd.f32 %v4441_v5, %v4358_v8 }
 0x6e5   : > { %v4519_v17 = vadd.f32 %v4514_v20, %v4442_v13  ;;  %v4520_v18 = vadd.f32 %v4516_v25, %v4443_v10 }
 0x6e6   : > { %v4597_v1 = vpop.permute.xlu0 %4596 }
 0x6e7   : > { %v4599_v7 = vpop.permute.xlu1 %4598 }
 0x6e8   : > { %v4600_v3 = vsel %vm3095_vm8, %v4597_v1, %v4599_v7  ;;  %v4601_v9 = vsel %vm3095_vm8, %v4599_v7, %v4597_v1 }
 0x6e9   : > { %v4602_v24 = vmul.f32 %v4600_v3, %v6214_v42  ;;  %v4603_v47 = vmul.f32 %v4601_v9, %v6216_v43 }
 0x6ea   : > { %v4682_v12 = vpop.permute.xlu0 %4681 }
 0x6eb   : > { %v4684_v14 = vpop.permute.xlu1 %4683  ;;  %v4604_v29 = vadd.f32 %v4602_v24, %v4519_v17  ;;  %v4605_v30 = vadd.f32 %v4603_v47, %v4520_v18 }
 0x6ec   : > { %v4685_v11 = vsel %vm3418_vm9, %v4682_v12, %v4684_v14  ;;  %v4686_v22 = vsel %vm3418_vm9, %v4684_v14, %v4682_v12 }
 0x6ed   : > { %v4687_v58 = vmul.f32 %v4685_v11, %v6224_v49  ;;  %v4688_v19 = vmul.f32 %v4686_v22, %v6226_v52 }
 0x6ee   : > { %v4767_v16 = vpop.permute.xlu0 %4766 }
 0x6ef   : > { %v4769_v26 = vpop.permute.xlu1 %4768  ;;  %v4689_v20 = vadd.f32 %v4687_v58, %v4604_v29  ;;  %v4690_v25 = vadd.f32 %v4688_v19, %v4605_v30 }
 0x6f0   : > { %v4770_v27 = vsel %vm3741_vm10, %v4767_v16, %v4769_v26  ;;  %v4771_v28 = vsel %vm3741_vm10, %v4769_v26, %v4767_v16 }
 0x6f1   : > { %v4772_v42 = vmul.f32 %v4770_v27, %v6235_v62  ;;  %v4773_v43 = vmul.f32 %v4771_v28, %v6237_v63 }
 0x6f2   : > { %v4852_v37 = vpop.permute.xlu0 %4851 }
 0x6f3   : > { %v4854_v31 = vpop.permute.xlu1 %4853  ;;  %v4774_v32 = vadd.f32 %v4772_v42, %v4689_v20  ;;  %v4775_v33 = vadd.f32 %v4773_v43, %v4690_v25 }
 0x6f4   : > { %v4855_v49 = vsel %vm4063_vm11, %v4852_v37, %v4854_v31  ;;  %v4856_v52 = vsel %vm4063_vm11, %v4854_v31, %v4852_v37 }
 0x6f5   : > { %v4857_v61 = vmul.f32 %v6253_v15, %v4855_v49  ;;  %v4858_v34 = vmul.f32 %v6258_v46, %v4856_v52 }
 0x6f7   : > { %v4859_v35 = vadd.f32 %v4857_v61, %v4774_v32  ;;  %v4860_v62 = vadd.f32 %v4858_v34, %v4775_v33 }
 0x6f9   : > { %v4861_v36 = vadd.f32 %v4860_v62, %v4859_v35 }
 0x6fb   : > { %4862 = vadd.xlane.f32.xlu0 %v4861_v36 }
 0x788   : > { %v4863_v63 = vpop.xlane.xlu0 %4862 }
 0x789   : > { %v4864_v38 = vmul.f32 0.00390625, %v4863_v63 }
 0x78b   : > { %v4865_v40 = vsub.f32 %v4859_v35, %v4864_v38  ;;  %v4866_v44 = vsub.f32 %v4860_v62, %v4864_v38 }
 0x78d   : > { %v4867_v45 = vmul.f32 %v4865_v40, %v4865_v40  ;;  %v4868_v23 = vmul.f32 %v4866_v44, %v4866_v44 }
 0x78f   : > { %v4869_v48 = vadd.f32 %v4868_v23, %v4867_v45 }
 0x791   : > { %4870 = vadd.xlane.f32.xlu1 %v4869_v48 }
 0x81e   : > { %v4871_v41 = vpop.xlane.xlu1 %4870 }
 0x81f   : > { %v4872_v39 = vmul.f32 0.00390625, %v4871_v41 }
 0x821   : > { %v4873_v50 = vadd.f32 1e-05, %v4872_v39 }
 0x823   : > { %5539 = vrsqrt.f32 %v4873_v50 }
 0x82d   : > { %v5540_v15 = vpop.eup %5539 }
 0x82e   : > { %v4875_v51 = vmul.f32 %v5540_v15, %v4865_v40  ;;  %v4876_v46 = vmul.f32 %v5540_v15, %v4866_v44 }
 0x830   : > { %v4879_v53 = vmul.f32 0.70710677, %v4875_v51  ;;  %v4880_v54 = vmul.f32 0.70710677, %v4876_v46  ;;  %v4877_v59 = vmul.f32 0.5, %v4875_v51  ;;  %v4878_v21 = vmul.f32 0.5, %v4876_v46 }
 0x832   : > { %5541 = verf.f32 %v4879_v53 }
 0x833   : > { %5543 = verf.f32 %v4880_v54 }
 0x83c   : > { %v5542_v56 = vpop.eup %5541 }
 0x83d   : > { %v5544_v57 = vpop.eup %5543  ;;  %v4883_v60 = vadd.f32 1.0, %v5542_v56 }
 0x83e   : > { %v4884_v0 = vadd.f32 1.0, %v5544_v57 }
 0x83f   : > { %v4885_v1 = vmul.f32 %v4883_v60, %v4877_v59 }
 0x840   : > { %v4886_v55 = vmul.f32 %v4884_v0, %v4878_v21 }
 0x841   : > { %4887 = vst [vmem:[%s428_s30] sm:$0xff] %v4885_v1 }
 0x842   : > { %4888 = vst [vmem:[%s428_s30 + $0x8] sm:$0xff] %v4886_v55 }
 0x843 PF: > { %s21_s13 = sadd.s32 1, %s5584_s13  }
 0x844   : > { %p18_p3 = scmp.ge.s32.totalorder %s21_s13, 4  }
 0x846   :  { %20 = sbr.rel (!%p18_p3) target bundleno = 1 (0x1), region = 104 }
 0x84d   :  { %4910 = vsyncpa [#allocation3], 1 }
 0x84e   :  { %4912 = vsyncpa [#allocation3 + $0x1], 1 }

</bundles_post_ra>
